<compile_context>
chip_gen: v6e
topology: v6e:2x2x1
jax: 0.10.0
libtpu: 0.0.40
codegen_flags: <defaults>
</compile_context>

<pallas_src>
import functools

import jax
import jax.numpy as jnp
from jax.experimental import pallas as pl
from jax.experimental.pallas import tpu as pltpu


# --------------------------------- kernel ---------------------------------- #

def _tcn_fused_kernel(x_ref, w0c1_ref, w0c2_ref, b0_ref,
                      w1_ref, b1_ref, w2_ref, b2_ref,
                      fcw_ref, sel_ref, red_ref, fcb_ref, o_ref,
                      *, seq_len, frame, hidden):
    """Fused 3-block TCN + FC head for a single batch element.

    x_ref   (1, F, Cin)  zero-padded input frame     o_ref (1, 1, NC)
    w0c1_ref (Cin, 3C): block-0 conv1 taps [a|b] + 1x1 downsample weight, concatenated
    w0c2_ref (C, 2C):   block-0 conv2 taps [a|b]
    b0_ref   (3, 1, C): block-0 biases [conv1, conv2, downsample]
    w{1,2}_ref (2, C, 2C): blocks 1/2 [conv1 [a|b], conv2 [a|b]]
    b{1,2}_ref (2, 1, C):  blocks 1/2 biases [conv1, conv2]
    fcw_ref (C, F*NC), sel_ref (F, F*NC), red_ref (F*NC, NC), fcb_ref (1, NC)
    """
    F, C, T = frame, hidden, seq_len
    row = jax.lax.broadcasted_iota(jnp.int32, (F, C), 0)         # output-row index plane

    def shift_down(y, d):
        # (S_d y): row i <- y[i - d], zeros for i < d.  Rotation on the XLU + row mask;
        # exactly equivalent to the one-hot shift matmul it replaces.
        return jnp.where(row < d, 0.0, pltpu.roll(y, shift=d, axis=0))

    def conv_pair(h, wcat, bias, d, valid_out):
        """Conv1d(k=2, stride=1, dilation=d, padding=d) + ReLU on a zero frame.

        One matmul computes both taps ([Wa|Wb] concatenated); the tap-a half is shifted
        down by d (zeros shift in at the top).  Rows >= valid_out are forced back to
        zero so the frame invariant holds.
        """
        y = jnp.dot(h, wcat, preferred_element_type=jnp.float32)           # (F, 2C)
        y = shift_down(y[:, :C], d) + y[:, C:2 * C] + bias
        return jnp.where(row < valid_out, jnp.maximum(y, 0.0), 0.0)

    h = x_ref[0]                                   # (F, Cin); rows >= T already zero

    # ---- block 0: Cin -> C, dilation 1, 1x1 downsample fused into conv1's matmul ----
    d, L = 1, T
    y = jnp.dot(h, w0c1_ref[...], preferred_element_type=jnp.float32)      # (F, 3C)
    ident = jnp.where(row < L, y[:, 2 * C:3 * C] + b0_ref[2], 0.0)         # valid [0, L)
    h1 = jnp.where(row < L + d,
                   jnp.maximum(shift_down(y[:, :C], d) + y[:, C:2 * C] + b0_ref[0], 0.0),
                   0.0)
    h2 = conv_pair(h1, w0c2_ref[...], b0_ref[1], d, L + 2 * d)
    h = jnp.maximum(h2 + ident, 0.0)               # residual end-padding = zero rows

    # ---- block 1: C -> C, dilation 2 (identity = block input, already zero-padded) ----
    d, L = 2, T + 2
    h1 = conv_pair(h, w1_ref[0], b1_ref[0], d, L + d)
    h2 = conv_pair(h1, w1_ref[1], b1_ref[1], d, L + 2 * d)
    h = jnp.maximum(h2 + h, 0.0)

    # ---- block 2: C -> C, dilation 4 ----
    d, L = 4, T + 6
    h1 = conv_pair(h, w2_ref[0], b2_ref[0], d, L + d)
    h2 = conv_pair(h1, w2_ref[1], b2_ref[1], d, L + 2 * d)
    h = jnp.maximum(h2 + h, 0.0)

    # ---- FC head: wide matmul + diag-block select + block-sum matmul + colsum ----
    # Y[t', t*NC+n] = h[t',:] @ W_t[:,n]; SEL keeps t'==t; RED sums blocks per class.
    y = jnp.dot(h, fcw_ref[...], preferred_element_type=jnp.float32)       # (F, F*NC)
    z = jnp.dot(y * sel_ref[...], red_ref[...],
                preferred_element_type=jnp.float32)                        # (F, NC)
    # TODO(synk): nn.Dropout(0.2) after the FC is stochastic in training mode; applied
    # as identity (eval semantics) to keep the kernel deterministic.
    o_ref[0] = jnp.sum(z, axis=0, keepdims=True) + fcb_ref[...]


# --------------------------------- wrapper --------------------------------- #

def temporal_conv_net_forward(params, x_ncw):
    """x_ncw: (B, C_in, T) exactly like the PyTorch module. Returns (B, num_classes)."""
    B, cin, T = x_ncw.shape
    hidden = params["blk0_b"].shape[-1]
    nc = params["fc_b"].shape[-1]
    t_final = T + 2 * (1 + 2 + 4)                                # 30
    frame = ((t_final + 7) // 8) * 8                             # sublane-aligned frame
    assert params["fc_sel"].shape == (frame, frame * nc)

    # channels -> lanes + one-time zero pad to the aligned frame (the only XLA glue).
    x_btc = jnp.transpose(x_ncw, (0, 2, 1)).astype(jnp.float32)
    x_pad = jnp.pad(x_btc, ((0, 0), (0, frame - T), (0, 0)))     # (B, F, Cin)

    inputs = (x_pad,
              params["blk0_w1"], params["blk0_w2"], params["blk0_b"],
              params["blk1_w"], params["blk1_b"],
              params["blk2_w"], params["blk2_b"],
              params["fc_wwide"], params["fc_sel"], params["fc_red"], params["fc_b"])

    def full_spec(a):
        return pl.BlockSpec(a.shape, lambda b, _n=a.ndim: (0,) * _n)

    in_specs = [pl.BlockSpec((1, frame, cin), lambda b: (b, 0, 0))]
    in_specs += [full_spec(a) for a in inputs[1:]]

    # Advisory cost hint for XLA's scheduler.
    H, F = hidden, frame
    flops_per_batch = (
        2 * F * cin * (3 * H)              # block-0 conv1 + downsample (one matmul)
        + 5 * 2 * F * H * (2 * H)          # remaining 5 k=2 convs
        + 2 * F * H * (F * nc)             # FC wide matmul
        + 2 * F * (F * nc) * nc)           # FC block-sum matmul
    bytes_accessed = sum(int(a.size) * a.dtype.itemsize for a in inputs) + B * nc * 4

    kernel = functools.partial(_tcn_fused_kernel, seq_len=T, frame=frame, hidden=hidden)

    out = pl.pallas_call(
        kernel,
        out_shape=jax.ShapeDtypeStruct((B, 1, nc), jnp.float32),
        grid=(B,),
        in_specs=in_specs,
        out_specs=pl.BlockSpec((1, 1, nc), lambda b: (b, 0, 0)),
        compiler_params=pltpu.CompilerParams(dimension_semantics=("parallel",)),
        cost_estimate=pl.CostEstimate(flops=int(B * flops_per_batch), transcendentals=0,
                                      bytes_accessed=int(bytes_accessed)),
    )(*inputs)
    return out[:, 0, :]


# --------------------------- parameter construction ------------------------ #

def init_params(key, input_size, output_size, timesteps, num_classes, kernel_size=2):
    """Deterministic synthetic parameters with the PyTorch module's shapes/init ranges.

    Conv1d weights (Cout, Cin, 2) are stored as concatenated (Cin, 2*Cout) tap matrices
    ([Wa|Wb]; block-0 conv1 also carries the 1x1 downsample: [Wa|Wb|Wdown]) so each conv
    is one wide MXU matmul.  fc_w rows are generated in the kernel's time-major
    (t*C + c) order -- the free init-time row permutation of the PyTorch
    (num_classes, C*T') weight.  (The PyTorch forward re-creates self.fc with fresh
    random weights on every call; we materialize it deterministically once.)  The
    kernel-side FC layout (wide weight, diag-block selector, block-sum reducer) is also
    derived here, at init time.
    """
    assert kernel_size == 2
    H = output_size
    num_levels = 3
    u = lambda k, shape, s: jax.random.uniform(k, shape, jnp.float32, -s, s)

    s1 = float(input_size * kernel_size) ** -0.5
    s2 = float(H * kernel_size) ** -0.5
    sd = float(input_size) ** -0.5
    key, *ks = jax.random.split(key, 9)
    w1a, w1b = u(ks[0], (input_size, H), s1), u(ks[1], (input_size, H), s1)
    b1 = u(ks[2], (1, H), s1)
    w2a, w2b = u(ks[3], (H, H), s2), u(ks[4], (H, H), s2)
    b2 = u(ks[5], (1, H), s2)
    wd, bd = u(ks[6], (input_size, H), sd), u(ks[7], (1, H), sd)

    params = {
        "blk0_w1": jnp.concatenate([w1a, w1b, wd], axis=1),      # (Cin, 3H)
        "blk0_w2": jnp.concatenate([w2a, w2b], axis=1),          # (H, 2H)
        "blk0_b": jnp.stack([b1, b2, bd]),                       # (3, 1, H)
    }
    for i in (1, 2):
        key, *ks = jax.random.split(key, 7)
        s = float(H * kernel_size) ** -0.5
        taps = [u(ks[j], (H, H), s) for j in range(4)]           # conv1 a/b, conv2 a/b
        params[f"blk{i}_w"] = jnp.stack(
            [jnp.concatenate(taps[:2], axis=1), jnp.concatenate(taps[2:], axis=1)])
        params[f"blk{i}_b"] = jnp.stack([u(ks[4], (1, H), s), u(ks[5], (1, H), s)])

    t_final = timesteps + sum(2 * 2 ** i for i in range(num_levels))   # T + 14
    frame = ((t_final + 7) // 8) * 8
    fc_in = H * t_final
    sf = float(fc_in) ** -0.5
    key, kw, kb = jax.random.split(key, 3)
    fc_w = u(kw, (fc_in, num_classes), sf)        # rows in time-major (t*C + c) order
    params["fc_w"] = fc_w                         # reference layout
    params["fc_b"] = u(kb, (1, num_classes), sf)

    # Kernel-side FC layout (all free, init-time transforms):
    #   fc_wwide[c, t*NC + n] = fc_w[t*C + c, n]  (zero rows for t >= t_final)
    #   fc_sel[t', k] = 1 iff k // NC == t'       (diag-block selector)
    #   fc_red[k, n]  = 1 iff k %  NC == n        (block-sum reducer)
    w3 = fc_w.reshape(t_final, H, num_classes)
    w3 = jnp.pad(w3, ((0, frame - t_final), (0, 0), (0, 0)))
    params["fc_wwide"] = jnp.transpose(w3, (1, 0, 2)).reshape(H, frame * num_classes)
    k_idx = jnp.arange(frame * num_classes)
    params["fc_sel"] = (k_idx[None, :] // num_classes
                        == jnp.arange(frame)[:, None]).astype(jnp.float32)
    params["fc_red"] = (k_idx[:, None] % num_classes
                        == jnp.arange(num_classes)[None, :]).astype(jnp.float32)
    return params


# ------------------------------ pure-JAX reference ------------------------- #

def _reference_forward(params, x_ncw):
    """Plain-jnp reference of the PyTorch forward (eval mode) for a numerics check."""
    hp_prec = jax.lax.Precision.HIGHEST
    H = params["blk0_b"].shape[-1]
    x = jnp.transpose(x_ncw, (0, 2, 1)).astype(jnp.float32)      # (B, T, Cin)

    def conv_k2(h, wa, wb, bias, d):
        L = h.shape[1]
        hp = jnp.pad(h, ((0, 0), (d, d), (0, 0)))
        lo = L + d
        return (jnp.einsum("btc,cd->btd", hp[:, :lo, :], wa, precision=hp_prec)
                + jnp.einsum("btc,cd->btd", hp[:, d:d + lo, :], wb, precision=hp_prec)
                + bias)

    def block(h, wa1, wb1, b1, wa2, wb2, b2, d, wd=None, bd=None):
        out = jax.nn.relu(conv_k2(h, wa1, wb1, b1, d))
        out = jax.nn.relu(conv_k2(out, wa2, wb2, b2, d))
        ident = h if wd is None else jnp.einsum("btc,cd->btd", h, wd, precision=hp_prec) + bd
        ident = jnp.pad(ident, ((0, 0), (0, out.shape[1] - ident.shape[1]), (0, 0)))
        return jax.nn.relu(out + ident)

    w01, w02, b0 = params["blk0_w1"], params["blk0_w2"], params["blk0_b"]
    h = block(x, w01[:, :H], w01[:, H:2 * H], b0[0], w02[:, :H], w02[:, H:2 * H], b0[1],
              1, w01[:, 2 * H:3 * H], b0[2])
    for i, d in ((1, 2), (2, 4)):
        w, b = params[f"blk{i}_w"], params[f"blk{i}_b"]
        h = block(h, w[0][:, :H], w[0][:, H:], b[0], w[1][:, :H], w[1][:, H:], b[1], d)
    flat = h.reshape(h.shape[0], -1)                             # (B, T'*C), time-major
    return jnp.dot(flat, params["fc_w"], precision=hp_prec) + params["fc_b"]


# ----------------------------------- main ----------------------------------- #

if __name__ == "__main__":
    input_size = 4      # input channels
    output_size = 32    # hidden/output channels of every TemporalBlock
    timesteps = 16      # sequence length T
    num_classes = 10
    batch = 2

    key = jax.random.PRNGKey(0)
    key, kx = jax.random.split(key)
    x = jax.random.normal(kx, (batch, input_size, timesteps), dtype=jnp.float32)

    params = init_params(key, input_size, output_size, timesteps, num_classes)

    out = temporal_conv_net_forward(params, x)
    out = jax.block_until_ready(out)
    assert out.shape == (batch, num_classes), out.shape
    assert bool(jnp.all(jnp.isfinite(out)))

    ref = _reference_forward(params, x)
    max_err = float(jnp.max(jnp.abs(out - ref)))
    assert bool(jnp.allclose(out, ref, rtol=1e-2, atol=1e-2)), max_err

    print("KERNEL_OK")
</pallas_src>

<mosaic_0001>
module attributes {stable_mosaic.version = 11 : i64} {
  func.func @_tcn_fused_kernel(%arg0: i32, %arg1: memref<1x32x4xf32, #tpu.memory_space<vmem>>, %arg2: memref<4x96xf32, #tpu.memory_space<vmem>>, %arg3: memref<32x64xf32, #tpu.memory_space<vmem>>, %arg4: memref<3x1x32xf32, #tpu.memory_space<vmem>>, %arg5: memref<2x32x64xf32, #tpu.memory_space<vmem>>, %arg6: memref<2x1x32xf32, #tpu.memory_space<vmem>>, %arg7: memref<2x32x64xf32, #tpu.memory_space<vmem>>, %arg8: memref<2x1x32xf32, #tpu.memory_space<vmem>>, %arg9: memref<32x320xf32, #tpu.memory_space<vmem>>, %arg10: memref<32x320xf32, #tpu.memory_space<vmem>>, %arg11: memref<320x10xf32, #tpu.memory_space<vmem>>, %arg12: memref<1x10xf32, #tpu.memory_space<vmem>>, %arg13: memref<1x1x10xf32, #tpu.memory_space<vmem>>) attributes {dimension_semantics = [#tpu.dimension_semantics<parallel>], iteration_bounds = array<i64: 2>, scalar_prefetch = 0 : i64, scratch_operands = 0 : i64, tpu.core_type = #tpu.core_type<tc>, window_params = [{transform_indices = @transform_0, window_bounds = array<i64: 1, 32, 4>}, {pipeline_mode = #tpu.pipeline_mode<synchronous>, transform_indices = @transform_1, window_bounds = array<i64: 4, 96>}, {pipeline_mode = #tpu.pipeline_mode<synchronous>, transform_indices = @transform_2, window_bounds = array<i64: 32, 64>}, {pipeline_mode = #tpu.pipeline_mode<synchronous>, transform_indices = @transform_3, window_bounds = array<i64: 3, 1, 32>}, {pipeline_mode = #tpu.pipeline_mode<synchronous>, transform_indices = @transform_4, window_bounds = array<i64: 2, 32, 64>}, {pipeline_mode = #tpu.pipeline_mode<synchronous>, transform_indices = @transform_5, window_bounds = array<i64: 2, 1, 32>}, {pipeline_mode = #tpu.pipeline_mode<synchronous>, transform_indices = @transform_6, window_bounds = array<i64: 2, 32, 64>}, {pipeline_mode = #tpu.pipeline_mode<synchronous>, transform_indices = @transform_7, window_bounds = array<i64: 2, 1, 32>}, {pipeline_mode = #tpu.pipeline_mode<synchronous>, transform_indices = @transform_8, window_bounds = array<i64: 32, 320>}, {pipeline_mode = #tpu.pipeline_mode<synchronous>, transform_indices = @transform_9, window_bounds = array<i64: 32, 320>}, {pipeline_mode = #tpu.pipeline_mode<synchronous>, transform_indices = @transform_10, window_bounds = array<i64: 320, 10>}, {pipeline_mode = #tpu.pipeline_mode<synchronous>, transform_indices = @transform_11, window_bounds = array<i64: 1, 10>}, {transform_indices = @transform_12, window_bounds = array<i64: 1, 1, 10>}]} {
    %0 = tpu.iota {dimensions = array<i32: 0>} : vector<32x32xi32>
    %c0 = arith.constant 0 : index
    %c0_0 = arith.constant 0 : index
    %c0_1 = arith.constant 0 : index
    %1 = vector.load %arg1[%c0, %c0_0, %c0_1] : memref<1x32x4xf32, #tpu.memory_space<vmem>>, vector<1x32x4xf32>
    %2 = vector.shape_cast %1 : vector<1x32x4xf32> to vector<32x4xf32>
    %c0_2 = arith.constant 0 : index
    %c0_3 = arith.constant 0 : index
    %3 = vector.load %arg2[%c0_2, %c0_3] : memref<4x96xf32, #tpu.memory_space<vmem>>, vector<4x96xf32>
    %cst = arith.constant dense<0.000000e+00> : vector<32x96xf32>
    %4 = tpu.matmul %2, %3, %cst {dimension_numbers = #tpu.dot_dimension_numbers<[1], [0], [0], [1], [0, 0, 1, 1], [], []>} : vector<32x4xf32>, vector<4x96xf32>, vector<32x96xf32> -> vector<32x96xf32>
    %c16_i32 = arith.constant 16 : i32
    %5 = vector.broadcast %c16_i32 : i32 to vector<32x32xi32>
    %6 = arith.cmpi slt, %0, %5 : vector<32x32xi32>
    %7 = vector.extract_strided_slice %4 {offsets = [0, 64], sizes = [32, 32], strides = [1, 1]} : vector<32x96xf32> to vector<32x32xf32>
    %c2 = arith.constant 2 : index
    %c0_4 = arith.constant 0 : index
    %c0_5 = arith.constant 0 : index
    %8 = vector.load %arg4[%c2, %c0_4, %c0_5] : memref<3x1x32xf32, #tpu.memory_space<vmem>>, vector<1x1x32xf32>
    %9 = vector.shape_cast %8 : vector<1x1x32xf32> to vector<1x32xf32>
    %10 = vector.broadcast %9 : vector<1x32xf32> to vector<32x32xf32>
    %11 = arith.addf %7, %10 : vector<32x32xf32>
    %cst_6 = arith.constant 0.000000e+00 : f32
    %12 = vector.broadcast %cst_6 : f32 to vector<32x32xf32>
    %13 = arith.select %6, %11, %12 : vector<32x32xi1>, vector<32x32xf32>
    %c17_i32 = arith.constant 17 : i32
    %14 = vector.broadcast %c17_i32 : i32 to vector<32x32xi32>
    %15 = arith.cmpi slt, %0, %14 : vector<32x32xi32>
    %16 = vector.extract_strided_slice %4 {offsets = [0, 0], sizes = [32, 32], strides = [1, 1]} : vector<32x96xf32> to vector<32x32xf32>
    %c1_i32 = arith.constant 1 : i32
    %17 = vector.broadcast %c1_i32 : i32 to vector<32x32xi32>
    %18 = arith.cmpi slt, %0, %17 : vector<32x32xi32>
    %c1_i32_7 = arith.constant 1 : i32
    %19 = tpu.dynamic_rotate %16 by %c1_i32_7 dim 0 : vector<32x32xf32>, i32 -> vector<32x32xf32>
    %cst_8 = arith.constant 0.000000e+00 : f32
    %20 = vector.broadcast %cst_8 : f32 to vector<32x32xf32>
    %21 = arith.select %18, %20, %19 : vector<32x32xi1>, vector<32x32xf32>
    %22 = vector.extract_strided_slice %4 {offsets = [0, 32], sizes = [32, 32], strides = [1, 1]} : vector<32x96xf32> to vector<32x32xf32>
    %23 = arith.addf %21, %22 : vector<32x32xf32>
    %c0_9 = arith.constant 0 : index
    %c0_10 = arith.constant 0 : index
    %c0_11 = arith.constant 0 : index
    %24 = vector.load %arg4[%c0_9, %c0_10, %c0_11] : memref<3x1x32xf32, #tpu.memory_space<vmem>>, vector<1x1x32xf32>
    %25 = vector.shape_cast %24 : vector<1x1x32xf32> to vector<1x32xf32>
    %26 = vector.broadcast %25 : vector<1x32xf32> to vector<32x32xf32>
    %27 = arith.addf %23, %26 : vector<32x32xf32>
    %cst_12 = arith.constant 0.000000e+00 : f32
    %28 = vector.broadcast %cst_12 : f32 to vector<32x32xf32>
    %29 = arith.maximumf %27, %28 : vector<32x32xf32>
    %cst_13 = arith.constant 0.000000e+00 : f32
    %30 = vector.broadcast %cst_13 : f32 to vector<32x32xf32>
    %31 = arith.select %15, %29, %30 : vector<32x32xi1>, vector<32x32xf32>
    %c0_14 = arith.constant 0 : index
    %c0_15 = arith.constant 0 : index
    %32 = vector.load %arg3[%c0_14, %c0_15] : memref<32x64xf32, #tpu.memory_space<vmem>>, vector<32x64xf32>
    %c1 = arith.constant 1 : index
    %c0_16 = arith.constant 0 : index
    %c0_17 = arith.constant 0 : index
    %33 = vector.load %arg4[%c1, %c0_16, %c0_17] : memref<3x1x32xf32, #tpu.memory_space<vmem>>, vector<1x1x32xf32>
    %34 = vector.shape_cast %33 : vector<1x1x32xf32> to vector<1x32xf32>
    %cst_18 = arith.constant dense<0.000000e+00> : vector<32x64xf32>
    %35 = tpu.matmul %31, %32, %cst_18 {dimension_numbers = #tpu.dot_dimension_numbers<[1], [0], [0], [1], [0, 0, 1, 1], [], []>} : vector<32x32xf32>, vector<32x64xf32>, vector<32x64xf32> -> vector<32x64xf32>
    %36 = vector.extract_strided_slice %35 {offsets = [0, 0], sizes = [32, 32], strides = [1, 1]} : vector<32x64xf32> to vector<32x32xf32>
    %c1_i32_19 = arith.constant 1 : i32
    %37 = vector.broadcast %c1_i32_19 : i32 to vector<32x32xi32>
    %38 = arith.cmpi slt, %0, %37 : vector<32x32xi32>
    %c1_i32_20 = arith.constant 1 : i32
    %39 = tpu.dynamic_rotate %36 by %c1_i32_20 dim 0 : vector<32x32xf32>, i32 -> vector<32x32xf32>
    %cst_21 = arith.constant 0.000000e+00 : f32
    %40 = vector.broadcast %cst_21 : f32 to vector<32x32xf32>
    %41 = arith.select %38, %40, %39 : vector<32x32xi1>, vector<32x32xf32>
    %42 = vector.extract_strided_slice %35 {offsets = [0, 32], sizes = [32, 32], strides = [1, 1]} : vector<32x64xf32> to vector<32x32xf32>
    %43 = arith.addf %41, %42 : vector<32x32xf32>
    %44 = vector.broadcast %34 : vector<1x32xf32> to vector<32x32xf32>
    %45 = arith.addf %43, %44 : vector<32x32xf32>
    %c18_i32 = arith.constant 18 : i32
    %46 = vector.broadcast %c18_i32 : i32 to vector<32x32xi32>
    %47 = arith.cmpi slt, %0, %46 : vector<32x32xi32>
    %cst_22 = arith.constant 0.000000e+00 : f32
    %48 = vector.broadcast %cst_22 : f32 to vector<32x32xf32>
    %49 = arith.maximumf %45, %48 : vector<32x32xf32>
    %cst_23 = arith.constant 0.000000e+00 : f32
    %50 = vector.broadcast %cst_23 : f32 to vector<32x32xf32>
    %51 = arith.select %47, %49, %50 : vector<32x32xi1>, vector<32x32xf32>
    %52 = arith.addf %51, %13 : vector<32x32xf32>
    %cst_24 = arith.constant 0.000000e+00 : f32
    %53 = vector.broadcast %cst_24 : f32 to vector<32x32xf32>
    %54 = arith.maximumf %52, %53 : vector<32x32xf32>
    %c0_25 = arith.constant 0 : index
    %c0_26 = arith.constant 0 : index
    %c0_27 = arith.constant 0 : index
    %55 = vector.load %arg5[%c0_25, %c0_26, %c0_27] : memref<2x32x64xf32, #tpu.memory_space<vmem>>, vector<1x32x64xf32>
    %56 = vector.shape_cast %55 : vector<1x32x64xf32> to vector<32x64xf32>
    %c0_28 = arith.constant 0 : index
    %c0_29 = arith.constant 0 : index
    %c0_30 = arith.constant 0 : index
    %57 = vector.load %arg6[%c0_28, %c0_29, %c0_30] : memref<2x1x32xf32, #tpu.memory_space<vmem>>, vector<1x1x32xf32>
    %58 = vector.shape_cast %57 : vector<1x1x32xf32> to vector<1x32xf32>
    %cst_31 = arith.constant dense<0.000000e+00> : vector<32x64xf32>
    %59 = tpu.matmul %54, %56, %cst_31 {dimension_numbers = #tpu.dot_dimension_numbers<[1], [0], [0], [1], [0, 0, 1, 1], [], []>} : vector<32x32xf32>, vector<32x64xf32>, vector<32x64xf32> -> vector<32x64xf32>
    %60 = vector.extract_strided_slice %59 {offsets = [0, 0], sizes = [32, 32], strides = [1, 1]} : vector<32x64xf32> to vector<32x32xf32>
    %c2_i32 = arith.constant 2 : i32
    %61 = vector.broadcast %c2_i32 : i32 to vector<32x32xi32>
    %62 = arith.cmpi slt, %0, %61 : vector<32x32xi32>
    %c2_i32_32 = arith.constant 2 : i32
    %63 = tpu.dynamic_rotate %60 by %c2_i32_32 dim 0 : vector<32x32xf32>, i32 -> vector<32x32xf32>
    %cst_33 = arith.constant 0.000000e+00 : f32
    %64 = vector.broadcast %cst_33 : f32 to vector<32x32xf32>
    %65 = arith.select %62, %64, %63 : vector<32x32xi1>, vector<32x32xf32>
    %66 = vector.extract_strided_slice %59 {offsets = [0, 32], sizes = [32, 32], strides = [1, 1]} : vector<32x64xf32> to vector<32x32xf32>
    %67 = arith.addf %65, %66 : vector<32x32xf32>
    %68 = vector.broadcast %58 : vector<1x32xf32> to vector<32x32xf32>
    %69 = arith.addf %67, %68 : vector<32x32xf32>
    %c20_i32 = arith.constant 20 : i32
    %70 = vector.broadcast %c20_i32 : i32 to vector<32x32xi32>
    %71 = arith.cmpi slt, %0, %70 : vector<32x32xi32>
    %cst_34 = arith.constant 0.000000e+00 : f32
    %72 = vector.broadcast %cst_34 : f32 to vector<32x32xf32>
    %73 = arith.maximumf %69, %72 : vector<32x32xf32>
    %cst_35 = arith.constant 0.000000e+00 : f32
    %74 = vector.broadcast %cst_35 : f32 to vector<32x32xf32>
    %75 = arith.select %71, %73, %74 : vector<32x32xi1>, vector<32x32xf32>
    %c1_36 = arith.constant 1 : index
    %c0_37 = arith.constant 0 : index
    %c0_38 = arith.constant 0 : index
    %76 = vector.load %arg5[%c1_36, %c0_37, %c0_38] : memref<2x32x64xf32, #tpu.memory_space<vmem>>, vector<1x32x64xf32>
    %77 = vector.shape_cast %76 : vector<1x32x64xf32> to vector<32x64xf32>
    %c1_39 = arith.constant 1 : index
    %c0_40 = arith.constant 0 : index
    %c0_41 = arith.constant 0 : index
    %78 = vector.load %arg6[%c1_39, %c0_40, %c0_41] : memref<2x1x32xf32, #tpu.memory_space<vmem>>, vector<1x1x32xf32>
    %79 = vector.shape_cast %78 : vector<1x1x32xf32> to vector<1x32xf32>
    %cst_42 = arith.constant dense<0.000000e+00> : vector<32x64xf32>
    %80 = tpu.matmul %75, %77, %cst_42 {dimension_numbers = #tpu.dot_dimension_numbers<[1], [0], [0], [1], [0, 0, 1, 1], [], []>} : vector<32x32xf32>, vector<32x64xf32>, vector<32x64xf32> -> vector<32x64xf32>
    %81 = vector.extract_strided_slice %80 {offsets = [0, 0], sizes = [32, 32], strides = [1, 1]} : vector<32x64xf32> to vector<32x32xf32>
    %c2_i32_43 = arith.constant 2 : i32
    %82 = vector.broadcast %c2_i32_43 : i32 to vector<32x32xi32>
    %83 = arith.cmpi slt, %0, %82 : vector<32x32xi32>
    %c2_i32_44 = arith.constant 2 : i32
    %84 = tpu.dynamic_rotate %81 by %c2_i32_44 dim 0 : vector<32x32xf32>, i32 -> vector<32x32xf32>
    %cst_45 = arith.constant 0.000000e+00 : f32
    %85 = vector.broadcast %cst_45 : f32 to vector<32x32xf32>
    %86 = arith.select %83, %85, %84 : vector<32x32xi1>, vector<32x32xf32>
    %87 = vector.extract_strided_slice %80 {offsets = [0, 32], sizes = [32, 32], strides = [1, 1]} : vector<32x64xf32> to vector<32x32xf32>
    %88 = arith.addf %86, %87 : vector<32x32xf32>
    %89 = vector.broadcast %79 : vector<1x32xf32> to vector<32x32xf32>
    %90 = arith.addf %88, %89 : vector<32x32xf32>
    %c22_i32 = arith.constant 22 : i32
    %91 = vector.broadcast %c22_i32 : i32 to vector<32x32xi32>
    %92 = arith.cmpi slt, %0, %91 : vector<32x32xi32>
    %cst_46 = arith.constant 0.000000e+00 : f32
    %93 = vector.broadcast %cst_46 : f32 to vector<32x32xf32>
    %94 = arith.maximumf %90, %93 : vector<32x32xf32>
    %cst_47 = arith.constant 0.000000e+00 : f32
    %95 = vector.broadcast %cst_47 : f32 to vector<32x32xf32>
    %96 = arith.select %92, %94, %95 : vector<32x32xi1>, vector<32x32xf32>
    %97 = arith.addf %96, %54 : vector<32x32xf32>
    %cst_48 = arith.constant 0.000000e+00 : f32
    %98 = vector.broadcast %cst_48 : f32 to vector<32x32xf32>
    %99 = arith.maximumf %97, %98 : vector<32x32xf32>
    %c0_49 = arith.constant 0 : index
    %c0_50 = arith.constant 0 : index
    %c0_51 = arith.constant 0 : index
    %100 = vector.load %arg7[%c0_49, %c0_50, %c0_51] : memref<2x32x64xf32, #tpu.memory_space<vmem>>, vector<1x32x64xf32>
    %101 = vector.shape_cast %100 : vector<1x32x64xf32> to vector<32x64xf32>
    %c0_52 = arith.constant 0 : index
    %c0_53 = arith.constant 0 : index
    %c0_54 = arith.constant 0 : index
    %102 = vector.load %arg8[%c0_52, %c0_53, %c0_54] : memref<2x1x32xf32, #tpu.memory_space<vmem>>, vector<1x1x32xf32>
    %103 = vector.shape_cast %102 : vector<1x1x32xf32> to vector<1x32xf32>
    %cst_55 = arith.constant dense<0.000000e+00> : vector<32x64xf32>
    %104 = tpu.matmul %99, %101, %cst_55 {dimension_numbers = #tpu.dot_dimension_numbers<[1], [0], [0], [1], [0, 0, 1, 1], [], []>} : vector<32x32xf32>, vector<32x64xf32>, vector<32x64xf32> -> vector<32x64xf32>
    %105 = vector.extract_strided_slice %104 {offsets = [0, 0], sizes = [32, 32], strides = [1, 1]} : vector<32x64xf32> to vector<32x32xf32>
    %c4_i32 = arith.constant 4 : i32
    %106 = vector.broadcast %c4_i32 : i32 to vector<32x32xi32>
    %107 = arith.cmpi slt, %0, %106 : vector<32x32xi32>
    %c4_i32_56 = arith.constant 4 : i32
    %108 = tpu.dynamic_rotate %105 by %c4_i32_56 dim 0 : vector<32x32xf32>, i32 -> vector<32x32xf32>
    %cst_57 = arith.constant 0.000000e+00 : f32
    %109 = vector.broadcast %cst_57 : f32 to vector<32x32xf32>
    %110 = arith.select %107, %109, %108 : vector<32x32xi1>, vector<32x32xf32>
    %111 = vector.extract_strided_slice %104 {offsets = [0, 32], sizes = [32, 32], strides = [1, 1]} : vector<32x64xf32> to vector<32x32xf32>
    %112 = arith.addf %110, %111 : vector<32x32xf32>
    %113 = vector.broadcast %103 : vector<1x32xf32> to vector<32x32xf32>
    %114 = arith.addf %112, %113 : vector<32x32xf32>
    %c26_i32 = arith.constant 26 : i32
    %115 = vector.broadcast %c26_i32 : i32 to vector<32x32xi32>
    %116 = arith.cmpi slt, %0, %115 : vector<32x32xi32>
    %cst_58 = arith.constant 0.000000e+00 : f32
    %117 = vector.broadcast %cst_58 : f32 to vector<32x32xf32>
    %118 = arith.maximumf %114, %117 : vector<32x32xf32>
    %cst_59 = arith.constant 0.000000e+00 : f32
    %119 = vector.broadcast %cst_59 : f32 to vector<32x32xf32>
    %120 = arith.select %116, %118, %119 : vector<32x32xi1>, vector<32x32xf32>
    %c1_60 = arith.constant 1 : index
    %c0_61 = arith.constant 0 : index
    %c0_62 = arith.constant 0 : index
    %121 = vector.load %arg7[%c1_60, %c0_61, %c0_62] : memref<2x32x64xf32, #tpu.memory_space<vmem>>, vector<1x32x64xf32>
    %122 = vector.shape_cast %121 : vector<1x32x64xf32> to vector<32x64xf32>
    %c1_63 = arith.constant 1 : index
    %c0_64 = arith.constant 0 : index
    %c0_65 = arith.constant 0 : index
    %123 = vector.load %arg8[%c1_63, %c0_64, %c0_65] : memref<2x1x32xf32, #tpu.memory_space<vmem>>, vector<1x1x32xf32>
    %124 = vector.shape_cast %123 : vector<1x1x32xf32> to vector<1x32xf32>
    %cst_66 = arith.constant dense<0.000000e+00> : vector<32x64xf32>
    %125 = tpu.matmul %120, %122, %cst_66 {dimension_numbers = #tpu.dot_dimension_numbers<[1], [0], [0], [1], [0, 0, 1, 1], [], []>} : vector<32x32xf32>, vector<32x64xf32>, vector<32x64xf32> -> vector<32x64xf32>
    %126 = vector.extract_strided_slice %125 {offsets = [0, 0], sizes = [32, 32], strides = [1, 1]} : vector<32x64xf32> to vector<32x32xf32>
    %c4_i32_67 = arith.constant 4 : i32
    %127 = vector.broadcast %c4_i32_67 : i32 to vector<32x32xi32>
    %128 = arith.cmpi slt, %0, %127 : vector<32x32xi32>
    %c4_i32_68 = arith.constant 4 : i32
    %129 = tpu.dynamic_rotate %126 by %c4_i32_68 dim 0 : vector<32x32xf32>, i32 -> vector<32x32xf32>
    %cst_69 = arith.constant 0.000000e+00 : f32
    %130 = vector.broadcast %cst_69 : f32 to vector<32x32xf32>
    %131 = arith.select %128, %130, %129 : vector<32x32xi1>, vector<32x32xf32>
    %132 = vector.extract_strided_slice %125 {offsets = [0, 32], sizes = [32, 32], strides = [1, 1]} : vector<32x64xf32> to vector<32x32xf32>
    %133 = arith.addf %131, %132 : vector<32x32xf32>
    %134 = vector.broadcast %124 : vector<1x32xf32> to vector<32x32xf32>
    %135 = arith.addf %133, %134 : vector<32x32xf32>
    %c30_i32 = arith.constant 30 : i32
    %136 = vector.broadcast %c30_i32 : i32 to vector<32x32xi32>
    %137 = arith.cmpi slt, %0, %136 : vector<32x32xi32>
    %cst_70 = arith.constant 0.000000e+00 : f32
    %138 = vector.broadcast %cst_70 : f32 to vector<32x32xf32>
    %139 = arith.maximumf %135, %138 : vector<32x32xf32>
    %cst_71 = arith.constant 0.000000e+00 : f32
    %140 = vector.broadcast %cst_71 : f32 to vector<32x32xf32>
    %141 = arith.select %137, %139, %140 : vector<32x32xi1>, vector<32x32xf32>
    %142 = arith.addf %141, %99 : vector<32x32xf32>
    %cst_72 = arith.constant 0.000000e+00 : f32
    %143 = vector.broadcast %cst_72 : f32 to vector<32x32xf32>
    %144 = arith.maximumf %142, %143 : vector<32x32xf32>
    %c0_73 = arith.constant 0 : index
    %c0_74 = arith.constant 0 : index
    %145 = vector.load %arg9[%c0_73, %c0_74] : memref<32x320xf32, #tpu.memory_space<vmem>>, vector<32x320xf32>
    %cst_75 = arith.constant dense<0.000000e+00> : vector<32x320xf32>
    %146 = tpu.matmul %144, %145, %cst_75 {dimension_numbers = #tpu.dot_dimension_numbers<[1], [0], [0], [1], [0, 0, 1, 1], [], []>} : vector<32x32xf32>, vector<32x320xf32>, vector<32x320xf32> -> vector<32x320xf32>
    %c0_76 = arith.constant 0 : index
    %c0_77 = arith.constant 0 : index
    %147 = vector.load %arg10[%c0_76, %c0_77] : memref<32x320xf32, #tpu.memory_space<vmem>>, vector<32x320xf32>
    %148 = arith.mulf %146, %147 : vector<32x320xf32>
    %c0_78 = arith.constant 0 : index
    %c0_79 = arith.constant 0 : index
    %149 = vector.load %arg11[%c0_78, %c0_79] : memref<320x10xf32, #tpu.memory_space<vmem>>, vector<320x10xf32>
    %cst_80 = arith.constant dense<0.000000e+00> : vector<32x10xf32>
    %150 = tpu.matmul %148, %149, %cst_80 {dimension_numbers = #tpu.dot_dimension_numbers<[1], [0], [0], [1], [0, 0, 1, 1], [], []>} : vector<32x320xf32>, vector<320x10xf32>, vector<32x10xf32> -> vector<32x10xf32>
    %cst_81 = arith.constant dense<0.000000e+00> : vector<10xf32>
    %151 = vector.multi_reduction <add>, %150, %cst_81 [0] : vector<32x10xf32> to vector<10xf32>
    %152 = vector.shape_cast %151 : vector<10xf32> to vector<1x10xf32>
    %c0_82 = arith.constant 0 : index
    %c0_83 = arith.constant 0 : index
    %153 = vector.load %arg12[%c0_82, %c0_83] : memref<1x10xf32, #tpu.memory_space<vmem>>, vector<1x10xf32>
    %154 = arith.addf %152, %153 : vector<1x10xf32>
    %c0_84 = arith.constant 0 : index
    %c0_85 = arith.constant 0 : index
    %c0_86 = arith.constant 0 : index
    %155 = vector.load %arg13[%c0_84, %c0_85, %c0_86] : memref<1x1x10xf32, #tpu.memory_space<vmem>>, vector<1x1x10xf32>
    %156 = vector.shape_cast %155 : vector<1x1x10xf32> to vector<1x10xf32>
    %157 = vector.shape_cast %154 : vector<1x10xf32> to vector<1x1x10xf32>
    tpu.vector_store %arg13[%c0_84, %c0_85, %c0_86], %157 {strides = array<i32>} : memref<1x1x10xf32, #tpu.memory_space<vmem>>, vector<1x1x10xf32>,
    return
  }
  func.func @transform_0(%arg0: i32) -> (i32, i32, i32) {
    %c0_i32 = arith.constant 0 : i32
    %c0_i32_0 = arith.constant 0 : i32
    %c0_i32_1 = arith.constant 0 : i32
    return %arg0, %c0_i32, %c0_i32_0 : i32, i32, i32
  }
  func.func @transform_1(%arg0: i32) -> (i32, i32) {
    %c0_i32 = arith.constant 0 : i32
    %c0_i32_0 = arith.constant 0 : i32
    %c0_i32_1 = arith.constant 0 : i32
    return %c0_i32, %c0_i32_0 : i32, i32
  }
  func.func @transform_2(%arg0: i32) -> (i32, i32) {
    %c0_i32 = arith.constant 0 : i32
    %c0_i32_0 = arith.constant 0 : i32
    %c0_i32_1 = arith.constant 0 : i32
    return %c0_i32, %c0_i32_0 : i32, i32
  }
  func.func @transform_3(%arg0: i32) -> (i32, i32, i32) {
    %c0_i32 = arith.constant 0 : i32
    %c0_i32_0 = arith.constant 0 : i32
    %c0_i32_1 = arith.constant 0 : i32
    %c0_i32_2 = arith.constant 0 : i32
    return %c0_i32, %c0_i32_0, %c0_i32_1 : i32, i32, i32
  }
  func.func @transform_4(%arg0: i32) -> (i32, i32, i32) {
    %c0_i32 = arith.constant 0 : i32
    %c0_i32_0 = arith.constant 0 : i32
    %c0_i32_1 = arith.constant 0 : i32
    %c0_i32_2 = arith.constant 0 : i32
    return %c0_i32, %c0_i32_0, %c0_i32_1 : i32, i32, i32
  }
  func.func @transform_5(%arg0: i32) -> (i32, i32, i32) {
    %c0_i32 = arith.constant 0 : i32
    %c0_i32_0 = arith.constant 0 : i32
    %c0_i32_1 = arith.constant 0 : i32
    %c0_i32_2 = arith.constant 0 : i32
    return %c0_i32, %c0_i32_0, %c0_i32_1 : i32, i32, i32
  }
  func.func @transform_6(%arg0: i32) -> (i32, i32, i32) {
    %c0_i32 = arith.constant 0 : i32
    %c0_i32_0 = arith.constant 0 : i32
    %c0_i32_1 = arith.constant 0 : i32
    %c0_i32_2 = arith.constant 0 : i32
    return %c0_i32, %c0_i32_0, %c0_i32_1 : i32, i32, i32
  }
  func.func @transform_7(%arg0: i32) -> (i32, i32, i32) {
    %c0_i32 = arith.constant 0 : i32
    %c0_i32_0 = arith.constant 0 : i32
    %c0_i32_1 = arith.constant 0 : i32
    %c0_i32_2 = arith.constant 0 : i32
    return %c0_i32, %c0_i32_0, %c0_i32_1 : i32, i32, i32
  }
  func.func @transform_8(%arg0: i32) -> (i32, i32) {
    %c0_i32 = arith.constant 0 : i32
    %c0_i32_0 = arith.constant 0 : i32
    %c0_i32_1 = arith.constant 0 : i32
    return %c0_i32, %c0_i32_0 : i32, i32
  }
  func.func @transform_9(%arg0: i32) -> (i32, i32) {
    %c0_i32 = arith.constant 0 : i32
    %c0_i32_0 = arith.constant 0 : i32
    %c0_i32_1 = arith.constant 0 : i32
    return %c0_i32, %c0_i32_0 : i32, i32
  }
  func.func @transform_10(%arg0: i32) -> (i32, i32) {
    %c0_i32 = arith.constant 0 : i32
    %c0_i32_0 = arith.constant 0 : i32
    %c0_i32_1 = arith.constant 0 : i32
    return %c0_i32, %c0_i32_0 : i32, i32
  }
  func.func @transform_11(%arg0: i32) -> (i32, i32) {
    %c0_i32 = arith.constant 0 : i32
    %c0_i32_0 = arith.constant 0 : i32
    %c0_i32_1 = arith.constant 0 : i32
    return %c0_i32, %c0_i32_0 : i32, i32
  }
  func.func @transform_12(%arg0: i32) -> (i32, i32, i32) {
    %c0_i32 = arith.constant 0 : i32
    %c0_i32_0 = arith.constant 0 : i32
    %c0_i32_1 = arith.constant 0 : i32
    return %arg0, %c0_i32, %c0_i32_0 : i32, i32, i32
  }
}

</mosaic_0001>

<bundles_post_ra>
// kernel: tpu_custom_call.1
= control target key start
LH: loop header
LB: loop body
LE: loop exit
PB: predicated region body
PF: predicated region fallthrough
CT: control target
= control target key end

     0   :  { %s2985_s0 = inlined_call_operand.vmem [shape: f32[2,32,4], index: 0, kind: input, shape index: {}]   ;;  %s2986_s1 = inlined_call_operand.vmem [shape: f32[4,96], index: 1, kind: input, shape index: {}]   ;;  %s2987_s2 = inlined_call_operand.vmem [shape: f32[32,64], index: 2, kind: input, shape index: {}]   ;;  %s2988_s3 = inlined_call_operand.vmem [shape: f32[3,1,32], index: 3, kind: input, shape index: {}]   ;;  %s2989_s4 = inlined_call_operand.vmem [shape: f32[2,32,64], index: 4, kind: input, shape index: {}]   ;;  %s2990_s5 = inlined_call_operand.vmem [shape: f32[2,1,32], index: 5, kind: input, shape index: {}]   ;;  %s2991_s6 = inlined_call_operand.vmem [shape: f32[2,32,64], index: 6, kind: input, shape index: {}]   ;;  %s2992_s7 = inlined_call_operand.vmem [shape: f32[2,1,32], index: 7, kind: input, shape index: {}]   ;;  %s2993_s8 = inlined_call_operand.vmem [shape: f32[32,320], index: 8, kind: input, shape index: {}]   ;;  %s2994_s9 = inlined_call_operand.vmem [shape: f32[32,320], index: 9, kind: input, shape index: {}]   ;;  %s2995_s10 = inlined_call_operand.vmem [shape: f32[320,10], index: 10, kind: input, shape index: {}]   ;;  %s2996_s11 = inlined_call_operand.vmem [shape: f32[1,10], index: 11, kind: input, shape index: {}]   ;;  %s2997_s12 = inlined_call_operand.hbm [shape: f32[2,1,10], index: 12, kind: output, shape index: {}]  }
   0x1   :  { %3002 = sst [smem:[#allocation5_spill]] %s2985_s0 }
   0x2   :  { %3003 = sst [smem:[#allocation6_spill]] %s2986_s1 }
   0x3   :  { %3004 = sst [smem:[#allocation7_spill]] %s2987_s2 }
   0x4   :  { %17 = vsyncpa [#allocation3], 0 }
   0x5   :  { %19 = vsyncpa [#allocation3 + $0x1], 0  ;;  %s2429_s21 = smov 0   ;;  %s2431_s22 = smov 0  }
   0x6   :  { %s2433_s23 = smov 0   ;;  %s2435_s24 = smov 0  }
   0x7 LB: > { %s2450_s25 = sadd.s32 4294967295, %s2358_s24   ;;  %s1969_s26 = sadd.s32 4294967294, %s2358_s24   ;;  %s2358_s24 = sphi %s2435_s24, %s3015_s24   ;;  %s2354_s23 = sphi %s2433_s23, %s3014_s23   ;;  %s2350_s22 = sphi %s2431_s22, %s3013_s22   ;;  %s2346_s21 = sphi %s2429_s21, %s3012_s21  }
   0x8   : > { %s2454_s27 = sadd.s32 1, %s2358_s24   ;;  %s289_s28 = sadd.s32 1, %s2354_s23 }
   0x9   : > { %s286_s29 = ssub.s32 %s2358_s24, %s2454_s27  ;;  %p299_p0 = scmp.ne.s32.totalorder %s2354_s23, %s2350_s22 }
   0xa   : > { %p287_p1 = scmp.eq.s32.totalorder %s286_s29, 0  ;;  %p300_p2 = scmp.eq.s32.totalorder %s2450_s25, 1 }
   0xb   : > { %p305_p3 = scmp.ne.s32.totalorder %s2350_s22, %s2346_s21  ;;  %p306_p4 = scmp.eq.s32.totalorder %s1969_s26, 1 }
   0xc   : > { %s2465_s30 = scalar_select %p287_p1, %s2354_s23, %s289_s28  }
   0xd   : > { %p2467_p5 = por %p300_p2, %p299_p0  ;;  %p2471_p6 = por %p306_p4, %p305_p3 }
   0xe   : > { %p1972_p7 = scmp.ge.s32.totalorder %s2358_s24, 1  ;;  %p365_p8 = scmp.lt.s32.totalorder %s2358_s24, 3 }
  0x10   : > { %p366_p9 = pnand %p1972_p7, %p365_p8 }
  0x11   : > { %s3007_s1 = sld [smem:[#allocation6_spill]] (!%p366_p9)  ;;  %p406_p10 = scmp.lt.s32.totalorder (!%p366_p9), %s2450_s25, 1 }
  0x12   : > { %369 = sbr.rel (%p366_p9) target bundleno = 2385 (0x951), region = 68  ;;  %s3008_s0 = sld [smem:[#allocation5_spill]] (!%p366_p9) }
  0x13   : > { %s3009_s2 = sld [smem:[#allocation7_spill]] (!%p366_p9)  ;;  %s2998_s15 = smov (!%p366_p9), 64  }
  0x14   : > { %s3011_s29 = smov (!%p366_p9), 96   ;;  %s404_s19 = sand.u32 (!%p366_p9), 1, %s2350_s22  }
  0x15   : > { %s405_s16 = scalar_lea.vmem (!%p366_p9), [#allocation2], %s404_s19  ;;  %s2363_s20 = smov (!%p366_p9), [#allocation2]  }
  0x16   : > { %s2302_s28 = sshll.u32 (!%p366_p9), %s2363_s20, 4  ;;  %s2303_s28 = int_to_ptr.vmem [resolvable:$false] %s2302_s28 }
  0x17   : > { %v420_v0 = vld [vmem:[%s3007_s1] sm:$0xf]  ;;  %vm434_vm0 = vcmask 1043456   ;;  %s407_s17 = scalar_select %p406_p10, %s2450_s25, 1  ;;  %vm421_vm1 = vcmask 31744   ;;  %v411_v14 = vlaneseq  ;;  %vm610_vm3 = vcmask 261120  }
  0x18   : > { %2142 = vmatprep.subr.msk.mxu0 %vm434_vm0, %v420_v0  ;;  %v1981_v13 = vld [vmem:[%s2988_s3 + $0x2] ss:$0 sm:$0xff]  ;;  %v1982_v22 = vld [vmem:[%s2988_s3] ss:$0 sm:$0xff]  ;;  %v2362_v39 = vmov 0.0   ;;  %v789_v40 = vld [vmem:[%s2989_s4 + $0x18] sm:$0xff] }
  0x19   : > { %2143 = vmatpush3.msk.msra.mxu0 %vm434_vm0, %v420_v0  ;;  %s2032_s18 = sshll.u32 %s407_s17, 5  ;;  %v607_v5 = vld [vmem:[%s3009_s2 + $0x18] sm:$0xff]  ;;  %v606_v6 = vld [vmem:[%s3009_s2 + $0x10] sm:$0xff]  ;;  %v605_v7 = vld [vmem:[%s3009_s2 + $0x8] sm:$0xff]  ;;  %v2507_v15 = vshrl.u32 %v411_v14, 7  ;;  %vm1700_vm12 = vcmask 523264  }
  0x1a   : > { %s410_s26 = scalar_lea.vmem %s3008_s0, %s2032_s18  ;;  %2150 = vmatprep.subr.mxu1 %v607_v5  ;;  %v604_v8 = vld [vmem:[%s3009_s2] sm:$0xff]  ;;  %v788_v41 = vld [vmem:[%s2989_s4 + $0x10] sm:$0xff]  ;;  %v787_v42 = vld [vmem:[%s2989_s4 + $0x8] sm:$0xff]  ;;  %s3010_s18 = smov 64   ;;  %vm1883_vm13 = vcmask 80896   ;;  %vm1899_vm14 = vcmask 73728  }
  0x1b   : > { %v416_v1 = vld [vmem:[%s410_s26] sm:$0xff]  ;;  %v417_v2 = vld [vmem:[%s410_s26 + $0x8] sm:$0xff]  ;;  %v418_v3 = vld [vmem:[%s410_s26 + $0x10] sm:$0xff]  ;;  %2151 = vmatpush3.msra.mxu1 %v607_v5  ;;  %vm549_vm2 = vcmp.lt.s32.totalorder %v2507_v15, 1  ;;  %v2523_v30 = vadd.s32 16, %v2507_v15  ;;  %vm888_vm6 = vcmp.lt.s32.totalorder %v2507_v15, 2 }
  0x1c   : > { %2144 = vmatprep.mubr.msk.f32.mxu0 %vm421_vm1, %v416_v1  ;;  %v419_v4 = vld [vmem:[%s410_s26 + $0x18] sm:$0xff]  ;;  %2152 = vmatprep.subr.mxu1 %v606_v6  ;;  %s3000_s26 = smov 96   ;;  %v786_v43 = vld [vmem:[%s2989_s4] sm:$0xff]  ;;  %vm1214_vm9 = vcmp.lt.s32.totalorder %v2507_v15, 4  ;;  %s1914_s17 = sshll.u32 %s405_s16, 4  ;;  %s1915_s17 = int_to_ptr.vmem [resolvable:$true] %s1914_s17 }
  0x1d   : > { %2145 = vmatmul.mubr.msk.f32.vlgmr.msra.gmra.mxu0 %vm421_vm1, %v417_v2  ;;  %2153 = vmatpush3.msra.mxu1 %v606_v6  ;;  %vm547_vm4 = vcmp.lt.s32.totalorder %v2523_v30, 17  ;;  %v1987_v59 = vld [vmem:[%s2988_s3 + $0x1] ss:$0 sm:$0xff]  ;;  %vm752_vm5 = vcmp.lt.s32.totalorder %v2523_v30, 18  ;;  %vm936_vm7 = vcmp.lt.s32.totalorder %v2523_v30, 20  ;;  %vm1094_vm8 = vcmp.lt.s32.totalorder %v2523_v30, 22  ;;  %p2305_p0 = scmp.lt.s32.totalorder %s1915_s17, %s2303_s28 }
  0x1e   : > { %2147 = vmatprep.mubr.msk.f32.mxu0 %vm421_vm1, %v418_v3  ;;  %2154 = vmatprep.subr.mxu1 %v605_v7  ;;  %s2298_s1 = scalar_lea.vmem %s1915_s17, 16 }
  0x1f   : > { %2155 = vmatpush3.msra.mxu1 %v605_v7  ;;  %p2299_p11 = scmp.ne.s32.totalorder %s1915_s17, %s2298_s1 }
  0x20   : > { %2156 = vmatprep.subr.mxu1 %v604_v8 }
  0x21   : > { %2148 = vmatmul.mubr.msk.f32.gmra.mxu0 %vm421_vm1, %v419_v4  ;;  %2157 = vmatpush3.msra.mxu1 %v604_v8  ;;  %p2300_p12 = pnand %p2299_p11, %p2467_p5 }
  0x22   : > { %2164 = vmatprep.subr.mxu1 %v789_v40 }
  0x23   : > { %p2301_p13 = pneg %p2300_p12 }
  0xdd   : > { %v2497_v9 = vpop.f32.mrf.mxu0 }
  0xde   : > { %v554_v24 = vrot.slane %v2497_v9, 7 }
  0xdf   : > { %v504_v10 = vpop.f32.mrf.mxu0 }
  0xe0   : > { %569 = vrot.lane.b32.xlu0 %v504_v10, %s3000_s26  ;;  %v553_v17 = vrot.slane %v504_v10, 7 }
  0xe1   : > { %v2149_v11 = vpop.f32.mrf.mxu0 }
  0xe2   : > { %v556_v16 = vrot.slane %v2149_v11, 7  ;;  %v559_v27 = vsel %vm549_vm2, %v553_v17, %v554_v24 }
  0xe3   : > { %v514_v12 = vpop.f32.mrf.mxu0 }
  0xe4   : > { %571 = vrot.lane.b32.xlu0 %v2497_v9, %s3000_s26  ;;  %573 = vrot.lane.b32.xlu1 %v514_v12, %s3000_s26  ;;  %v560_v18 = vsel %vm549_vm2, %v556_v16, %v553_v17  ;;  %v555_v19 = vrot.slane %v514_v12, 7 }
  0xe5   : > { %v561_v21 = vsel %vm549_vm2, 0.0, %v560_v18 }
  0xe6   : > { %v558_v29 = vsel %vm549_vm2, %v554_v24, %v555_v19  ;;  %v1993_v24 = vld [vmem:[%s2989_s4 + $0x20] sm:$0xff] }
  0xe8   : > { %534 = vrot.lane.b32.xlu1 %v1981_v13, %s2998_s15  ;;  %s1902_s15 = scalar_lea.sflag [#allocation3], %s404_s19 }
 0x152   : > { %v570_v20 = vpop.permute.xlu0 %569 }
 0x153   : > { %v581_v23 = vadd.f32 %v570_v20, %v561_v21  ;;  %v1996_v21 = vld [vmem:[%s2989_s4 + $0x38] sm:$0xff] }
 0x155   : > { %v592_v25 = vadd.f32 %v1982_v22, %v581_v23  ;;  %v1994_v23 = vld [vmem:[%s2989_s4 + $0x28] sm:$0xff] }
 0x156   : > { %v572_v26 = vpop.permute.xlu0 %571  ;;  %v574_v28 = vpop.permute.xlu1 %573 }
 0x157   : > { %v582_v31 = vadd.f32 %v572_v26, %v559_v27  ;;  %v583_v32 = vadd.f32 %v574_v28, %v558_v29  ;;  %v596_v33 = vmax.f32 %v592_v25, 0.0 }
 0x159   : > { %v593_v34 = vadd.f32 %v1982_v22, %v582_v31  ;;  %v594_v35 = vadd.f32 %v1982_v22, %v583_v32  ;;  %2158 = vmatprep.mubr.msk.f32.mxu1 %vm610_vm3, %v596_v33  ;;  %v1995_v22 = vld [vmem:[%s2989_s4 + $0x30] sm:$0xff] }
 0x15a   : > { %v535_v44 = vpop.permute.xlu1 %534 }
 0x15b   : > { %v597_v36 = vmax.f32 %v593_v34, 0.0  ;;  %v598_v37 = vmax.f32 %v594_v35, 0.0  ;;  %v537_v47 = vadd.f32 %v535_v44, %v504_v10  ;;  %v538_v55 = vadd.f32 %v2497_v9, %v535_v44 }
 0x15d   : > { %2159 = vmatmul.mubr.msk.f32.vlgmr.msra.gmra.mxu1 %vm610_vm3, %v597_v36  ;;  %v602_v38 = vsel %vm547_vm4, %v598_v37, 0.0  ;;  %v1992_v36 = vld [vmem:[%s2990_s5] ss:$0 sm:$0xff] }
 0x15e   : > { %2161 = vmatprep.mubr.msk.f32.mxu1 %vm610_vm3, %v602_v38  ;;  %2165 = vmatpush3.msra.mxu1 %v789_v40 }
 0x15f   : > { %2166 = vmatprep.subr.mxu1 %v788_v41 }
 0x160   : > { %2167 = vmatpush3.msra.mxu1 %v788_v41 }
 0x161   : > { %2162 = vmatmul.mubr.f32.gmra.mxu1 %v2362_v39  ;;  %2168 = vmatprep.subr.mxu1 %v787_v42 }
 0x162   : > { %2169 = vmatpush3.msra.mxu1 %v787_v42 }
 0x163   : > { %2170 = vmatprep.subr.mxu1 %v786_v43 }
 0x164   : > { %2171 = vmatpush3.msra.mxu1 %v786_v43 }
 0x165   : > { %2178 = vmatprep.subr.mxu1 %v1996_v21 }
 0x21d   : > { %v2160_v45 = vpop.f32.mrf.mxu1 }
 0x21e   : > { %726 = vrot.lane.b32.xlu1 %v2160_v45, %s3000_s26  ;;  %v709_v48 = vrot.slane %v2160_v45, 7 }
 0x21f   : > { %v689_v46 = vpop.f32.mrf.mxu1 }
 0x220   : > { %v708_v49 = vrot.slane %v689_v46, 7  ;;  %724 = vrot.lane.b32.xlu0 %v689_v46, %s3000_s26 }
 0x221   : > { %v2163_v50 = vpop.f32.mrf.mxu1 }
 0x222   : > { %v711_v51 = vrot.slane %v2163_v50, 7  ;;  %766 = vrot.lane.b32.xlu1 %v537_v47, %s3010_s18  ;;  %v714_v52 = vsel %vm549_vm2, %v708_v49, %v709_v48 }
 0x223   : > { %v699_v53 = vpop.f32.mrf.mxu1 }
 0x224   : > { %728 = vrot.lane.b32.xlu0 %v699_v53, %s3000_s26  ;;  %v715_v54 = vsel %vm549_vm2, %v711_v51, %v708_v49  ;;  %v710_v58 = vrot.slane %v699_v53, 7  ;;  %v1115_v53 = vld [vmem:[%s2991_s6 + $0x18] sm:$0xff] }
 0x225   : > { %v716_v61 = vsel %vm549_vm2, 0.0, %v715_v54  ;;  %2192 = vmatprep.subr.mxu0 %v1115_v53  ;;  %v1114_v54 = vld [vmem:[%s2991_s6 + $0x10] sm:$0xff] }
 0x226   : > { %770 = vrot.lane.b32.xlu1 %v2362_v39, %s3010_s18  ;;  %v713_v2 = vsel %vm549_vm2, %v709_v48, %v710_v58  ;;  %2193 = vmatpush3.msra.mxu0 %v1115_v53 }
 0x227   : > { %2194 = vmatprep.subr.mxu0 %v1114_v54 }
 0x228   : > { %768 = vrot.lane.b32.xlu0 %v538_v55, %s3010_s18  ;;  %2195 = vmatpush3.msra.mxu0 %v1114_v54  ;;  %v1113_v55 = vld [vmem:[%s2991_s6 + $0x8] sm:$0xff] }
 0x229   : > { %2196 = vmatprep.subr.mxu0 %v1113_v55 }
 0x22a   : > { %2197 = vmatpush3.msra.mxu0 %v1113_v55 }
 0x22c   : > { %772 = vrot.lane.b32.xlu0 %v2362_v39, %s3010_s18 }
 0x290   : > { %v727_v56 = vpop.permute.xlu1 %726 }
 0x291   : > { %v737_v57 = vadd.f32 %v727_v56, %v714_v52  ;;  %v1112_v56 = vld [vmem:[%s2991_s6] sm:$0xff] }
 0x292   : > { %v725_v60 = vpop.permute.xlu0 %724  ;;  %2198 = vmatprep.subr.mxu0 %v1112_v56 }
 0x293   : > { %v736_v62 = vadd.f32 %v725_v60, %v716_v61  ;;  %v747_v63 = vadd.f32 %v1987_v59, %v737_v57  ;;  %2199 = vmatpush3.msra.mxu0 %v1112_v56 }
 0x294   : > { %v767_v3 = vpop.permute.xlu1 %766 }
 0x295   : > { %v746_v0 = vadd.f32 %v1987_v59, %v736_v62  ;;  %v755_v8 = vmax.f32 %v747_v63, 0.0 }
 0x296   : > { %v729_v1 = vpop.permute.xlu0 %728 }
 0x297   : > { %v754_v4 = vmax.f32 %v746_v0, 0.0  ;;  %v738_v5 = vadd.f32 %v729_v1, %v713_v2  ;;  %v2001_v2 = vld [vmem:[%s2990_s5 + $0x1] ss:$0 sm:$0xff] }
 0x298   : > { %v771_v13 = vpop.permute.xlu1 %770 }
 0x299   : > { %v2563_v6 = vadd.f32 %v767_v3, %v754_v4  ;;  %v748_v7 = vadd.f32 %v1987_v59, %v738_v5 }
 0x29a   : > { %v769_v9 = vpop.permute.xlu0 %768 }
 0x29b   : > { %v782_v10 = vmax.f32 %v2563_v6, 0.0  ;;  %v756_v11 = vmax.f32 %v748_v7, 0.0  ;;  %v2567_v12 = vadd.f32 %v769_v9, %v755_v8 }
 0x29d   : > { %v783_v14 = vmax.f32 %v2567_v12, 0.0  ;;  %v760_v16 = vsel %vm752_vm5, %v756_v11, 0.0  ;;  %2172 = vmatprep.mubr.msk.f32.mxu1 %vm610_vm3, %v782_v10 }
 0x29e   : > { %v2573_v17 = vadd.f32 %v771_v13, %v760_v16  ;;  %v2575_v18 = vpop.permute.xlu0 %772 }
 0x29f   : > { %2173 = vmatmul.mubr.msk.f32.vlgmr.msra.gmra.mxu1 %vm610_vm3, %v783_v14  ;;  %v785_v19 = vmax.f32 %v2575_v18, 0.0  ;;  %v2008_v18 = vld [vmem:[%s2991_s6 + $0x28] sm:$0xff] }
 0x2a0   : > { %v784_v20 = vmax.f32 %v2573_v17, 0.0  ;;  %2179 = vmatpush3.msra.mxu1 %v1996_v21  ;;  %v2009_v17 = vld [vmem:[%s2991_s6 + $0x30] sm:$0xff] }
 0x2a1   : > { %2180 = vmatprep.subr.mxu1 %v1995_v22  ;;  %v2670_v30 = vmax.f32 %v785_v19, 0.0 }
 0x2a2   : > { %2175 = vmatprep.mubr.msk.f32.mxu1 %vm610_vm3, %v784_v20  ;;  %2181 = vmatpush3.msra.mxu1 %v1995_v22 }
 0x2a3   : > { %2176 = vmatmul.mubr.msk.f32.gmra.mxu1 %vm610_vm3, %v785_v19  ;;  %2182 = vmatprep.subr.mxu1 %v1994_v23  ;;  %v2007_v19 = vld [vmem:[%s2991_s6 + $0x20] sm:$0xff] }
 0x2a4   : > { %2183 = vmatpush3.msra.mxu1 %v1994_v23 }
 0x2a5   : > { %2184 = vmatprep.subr.mxu1 %v1993_v24 }
 0x2a6   : > { %2185 = vmatpush3.msra.mxu1 %v1993_v24 }
 0x35f   : > { %v2174_v25 = vpop.f32.mrf.mxu1 }
 0x360   : > { %910 = vrot.lane.b32.xlu0 %v2174_v25, %s3000_s26  ;;  %v893_v27 = vrot.slane %v2174_v25, 6 }
 0x361   : > { %v869_v26 = vpop.f32.mrf.mxu1 }
 0x362   : > { %v892_v28 = vrot.slane %v869_v26, 6  ;;  %908 = vrot.lane.b32.xlu1 %v869_v26, %s3000_s26 }
 0x363   : > { %v2177_v29 = vpop.f32.mrf.mxu1 }
 0x364   : > { %v895_v31 = vrot.slane %v2177_v29, 6  ;;  %v898_v32 = vsel %vm888_vm6, %v892_v28, %v893_v27 }
 0x365   : > { %v879_v33 = vpop.f32.mrf.mxu1 }
 0x366   : > { %912 = vrot.lane.b32.xlu1 %v879_v33, %s3000_s26  ;;  %v899_v34 = vsel %vm888_vm6, %v895_v31, %v892_v28  ;;  %v894_v38 = vrot.slane %v879_v33, 6 }
 0x367   : > { %v900_v41 = vsel %vm888_vm6, 0.0, %v899_v34 }
 0x368   : > { %v897_v46 = vsel %vm888_vm6, %v893_v27, %v894_v38 }
 0x3d2   : > { %v911_v35 = vpop.permute.xlu0 %910 }
 0x3d3   : > { %v921_v37 = vadd.f32 %v911_v35, %v898_v32 }
 0x3d4   : > { %v909_v40 = vpop.permute.xlu1 %908 }
 0x3d5   : > { %v920_v42 = vadd.f32 %v909_v40, %v900_v41  ;;  %v931_v43 = vadd.f32 %v1992_v36, %v921_v37 }
 0x3d7   : > { %v930_v44 = vadd.f32 %v1992_v36, %v920_v42  ;;  %v939_v49 = vmax.f32 %v931_v43, 0.0  ;;  %v2006_v42 = vld [vmem:[%s2992_s7] ss:$0 sm:$0xff] }
 0x3d8   : > { %v913_v45 = vpop.permute.xlu1 %912 }
 0x3d9   : > { %v938_v47 = vmax.f32 %v930_v44, 0.0  ;;  %v922_v48 = vadd.f32 %v913_v45, %v897_v46 }
 0x3db   : > { %v932_v50 = vadd.f32 %v1992_v36, %v922_v48  ;;  %2186 = vmatprep.mubr.msk.f32.mxu1 %vm610_vm3, %v938_v47 }
 0x3dc   : > { %2187 = vmatmul.mubr.msk.f32.vlgmr.msra.gmra.mxu1 %vm610_vm3, %v939_v49 }
 0x3dd   : > { %v940_v51 = vmax.f32 %v932_v50, 0.0 }
 0x3df   : > { %v944_v52 = vsel %vm936_vm7, %v940_v51, 0.0 }
 0x3e0   : > { %2189 = vmatprep.mubr.msk.f32.mxu1 %vm610_vm3, %v944_v52 }
 0x3e1   : > { %2190 = vmatmul.mubr.f32.gmra.mxu1 %v2362_v39 }
 0x49c   : > { %v2188_v57 = vpop.f32.mrf.mxu1 }
 0x49d   : > { %1068 = vrot.lane.b32.xlu1 %v2188_v57, %s3000_s26  ;;  %v1051_v59 = vrot.slane %v2188_v57, 6  ;;  %v2709_v57 = vadd.s32 24, %v2507_v15  ;;  %v1690_v15 = vld [vmem:[%s2995_s10 + $0xf0] sm:$0xff] }
 0x49e   : > { %v1031_v58 = vpop.f32.mrf.mxu1 }
 0x49f   : > { %v1050_v60 = vrot.slane %v1031_v58, 6  ;;  %1066 = vrot.lane.b32.xlu0 %v1031_v58, %s3000_s26  ;;  %vm1263_vm10 = vcmp.lt.s32.totalorder %v2709_v57, 26  ;;  %vm1421_vm11 = vcmp.lt.s32.totalorder %v2709_v57, 30 }
 0x4a1   : > { %v2191_v61 = vpop.f32.mrf.mxu1  ;;  %v1056_v62 = vsel %vm888_vm6, %v1050_v60, %v1051_v59 }
 0x4a2   : > { %v1053_v63 = vrot.slane %v2191_v61, 6 }
 0x4a3   : > { %v1041_v0 = vpop.f32.mrf.mxu1 }
 0x4a4   : > { %1070 = vrot.lane.b32.xlu0 %v1041_v0, %s3000_s26  ;;  %v1057_v1 = vsel %vm888_vm6, %v1053_v63, %v1050_v60  ;;  %v1052_v8 = vrot.slane %v1041_v0, 6  ;;  %v1448_v0 = vld [vmem:[%s2993_s8 + $0x50] sm:$0xff] }
 0x4a5   : > { %v1058_v7 = vsel %vm888_vm6, 0.0, %v1057_v1  ;;  %1486 = vmatprep.subr.mxu0 %v1448_v0  ;;  %v1447_v1 = vld [vmem:[%s2993_s8 + $0x48] sm:$0xff]  ;;  %v1671_v0 = vld [vmem:[%s2995_s10 + $0x58] sm:$0xff] }
 0x4a6   : > { %v1055_v23 = vsel %vm888_vm6, %v1051_v59, %v1052_v8  ;;  %v1441_v8 = vld [vmem:[%s2993_s8 + $0x18] sm:$0xff] }
 0x50f   : > { %v1069_v3 = vpop.permute.xlu1 %1068 }
 0x510   : > { %v1079_v4 = vadd.f32 %v1069_v3, %v1056_v62  ;;  %v1445_v3 = vld [vmem:[%s2993_s8 + $0x38] sm:$0xff] }
 0x511   : > { %v1067_v5 = vpop.permute.xlu0 %1066 }
 0x512   : > { %v1089_v9 = vadd.f32 %v2001_v2, %v1079_v4  ;;  %v1078_v11 = vadd.f32 %v1067_v5, %v1058_v7  ;;  %v1444_v4 = vld [vmem:[%s2993_s8 + $0x30] sm:$0xff]  ;;  %v1446_v5 = vld [vmem:[%s2993_s8 + $0x40] sm:$0xff] }
 0x513   : > { %v1442_v7 = vld [vmem:[%s2993_s8 + $0x20] sm:$0xff] }
 0x514   : > { %v1097_v13 = vmax.f32 %v1089_v9, 0.0  ;;  %v1088_v16 = vadd.f32 %v2001_v2, %v1078_v11  ;;  %v1443_v9 = vld [vmem:[%s2993_s8 + $0x28] sm:$0xff] }
 0x515   : > { %v1439_v11 = vld [vmem:[%s2993_s8 + $0x8] sm:$0xff] }
 0x516   : > { %v1096_v21 = vmax.f32 %v1088_v16, 0.0  ;;  %v1071_v22 = vpop.permute.xlu0 %1070  ;;  %v2648_v24 = vadd.f32 %v1097_v13, %v783_v14  ;;  %v2010_v14 = vld [vmem:[%s2991_s6 + $0x38] sm:$0xff]  ;;  %v1438_v13 = vld [vmem:[%s2993_s8] sm:$0xff]  ;;  %v1440_v16 = vld [vmem:[%s2993_s8 + $0x10] sm:$0xff] }
 0x517   : > { %v1080_v25 = vadd.f32 %v1071_v22, %v1055_v23  ;;  %2206 = vmatprep.subr.mxu1 %v2010_v14 }
 0x518   : > { %v2652_v26 = vadd.f32 %v1096_v21, %v782_v10  ;;  %v1109_v29 = vmax.f32 %v2648_v24, 0.0  ;;  %2207 = vmatpush3.msra.mxu1 %v2010_v14  ;;  %v1675_v24 = vld [vmem:[%s2995_s10 + $0x78] sm:$0xff] }
 0x519   : > { %v1090_v27 = vadd.f32 %v2001_v2, %v1080_v25  ;;  %2208 = vmatprep.subr.mxu1 %v2009_v17  ;;  %v1449_v2 = vld [vmem:[%s2993_s8 + $0x58] sm:$0xff] }
 0x51a   : > { %v1108_v28 = vmax.f32 %v2652_v26, 0.0  ;;  %2209 = vmatpush3.msra.mxu1 %v2009_v17  ;;  %v1698_v26 = vld [vmem:[%s2995_s10 + $0x130] sm:$0xff] }
 0x51b   : > { %v1098_v31 = vmax.f32 %v1090_v27, 0.0  ;;  %2210 = vmatprep.subr.mxu1 %v2008_v18 }
 0x51c   : > { %2200 = vmatprep.mubr.msk.f32.mxu0 %vm610_vm3, %v1108_v28  ;;  %2211 = vmatpush3.msra.mxu1 %v2008_v18  ;;  %v1691_v18 = vld [vmem:[%s2995_s10 + $0xf8] sm:$0xff] }
 0x51d   : > { %v1102_v12 = vsel %vm1094_vm8, %v1098_v31, 0.0  ;;  %2201 = vmatmul.mubr.msk.f32.vlgmr.msra.gmra.mxu0 %vm610_vm3, %v1109_v29  ;;  %2212 = vmatprep.subr.mxu1 %v2007_v19 }
 0x51e   : > { %v2665_v6 = vadd.f32 %v1102_v12, %v784_v20  ;;  %2213 = vmatpush3.msra.mxu1 %v2007_v19  ;;  %1487 = vmatpush1.msra.mxu0 %v1447_v1  ;;  %v1699_v19 = vld [vmem:[%s2995_s10 + $0x138] sm:$0xff]  ;;  %v1686_v1 = vld [vmem:[%s2995_s10 + $0xd0] sm:$0xff] }
 0x51f   : > { %2220 = vmatprep.subr.mxu1 %v1449_v2  ;;  %1488 = vmatprep.subr.mxu0 %v1445_v3  ;;  %v1696_v3 = vld [vmem:[%s2995_s10 + $0x120] sm:$0xff] }
 0x520   : > { %v1110_v10 = vmax.f32 %v2665_v6, 0.0  ;;  %1489 = vmatpush1.msra.mxu0 %v1444_v4  ;;  %v1673_v6 = vld [vmem:[%s2995_s10 + $0x68] sm:$0xff] }
 0x521   : > { %1490 = vmatprep.subr.mxu0 %v1442_v7  ;;  %v1669_v4 = vld [vmem:[%s2995_s10 + $0x48] sm:$0xff]  ;;  %v1684_v7 = vld [vmem:[%s2995_s10 + $0xc0] sm:$0xff] }
 0x522   : > { %2203 = vmatprep.mubr.msk.f32.mxu0 %vm610_vm3, %v1110_v10  ;;  %1491 = vmatpush1.msra.mxu0 %v1441_v8  ;;  %v1668_v8 = vld [vmem:[%s2995_s10 + $0x40] sm:$0xff] }
 0x523   : > { %2204 = vmatmul.mubr.msk.f32.gmra.mxu0 %vm610_vm3, %v2670_v30  ;;  %1492 = vmatprep.subr.mxu0 %v1439_v11  ;;  %v1667_v11 = vld [vmem:[%s2995_s10 + $0x38] sm:$0xff] }
 0x524   : > { %1526 = vmatprep.mubr.f32.mxu0 %v2362_v39  ;;  %1493 = vmatpush1.msra.mxu0 %v1438_v13  ;;  %v1682_v13 = vld [vmem:[%s2995_s10 + $0xb0] sm:$0xff] }
 0x525   : > { %2086 = vmatprep.subr.mxu0 %v1691_v18  ;;  %v1677_v18 = vld [vmem:[%s2995_s10 + $0x88] sm:$0xff] }
 0x5dd   : > { %v2202_v20 = vpop.f32.mrf.mxu0 }
 0x5de   : > { %1236 = vrot.lane.b32.xlu0 %v2202_v20, %s3000_s26  ;;  %v1219_v33 = vrot.slane %v2202_v20, 4  ;;  %v2016_v20 = vld [vmem:[%s2992_s7 + $0x1] ss:$0 sm:$0xff] }
 0x5df   : > { %v1195_v32 = vpop.f32.mrf.mxu0 }
 0x5e0   : > { %v1218_v34 = vrot.slane %v1195_v32, 4  ;;  %1234 = vrot.lane.b32.xlu1 %v1195_v32, %s3000_s26 }
 0x5e2   : > { %v1224_v35 = vsel %vm1214_vm9, %v1218_v34, %v1219_v33 }
 0x5e3   : > { %v2205_v36 = vpop.f32.mrf.mxu0 }
 0x5e4   : > { %v1221_v37 = vrot.slane %v2205_v36, 4  ;;  %1240 = vrot.lane.b32.xlu0 %v2205_v36, %s3000_s26 }
 0x5e5   : > { %v1205_v38 = vpop.f32.mrf.mxu0 }
 0x5e6   : > { %1238 = vrot.lane.b32.xlu1 %v1205_v38, %s3000_s26  ;;  %v1225_v40 = vsel %vm1214_vm9, %v1221_v37, %v1218_v34  ;;  %v1220_v44 = vrot.slane %v1205_v38, 4 }
 0x5e7   : > { %v1226_v46 = vsel %vm1214_vm9, 0.0, %v1225_v40 }
 0x5e8   : > { %v1222_v51 = vsel %vm1214_vm9, %v1220_v44, %v1221_v37  ;;  %v1223_v56 = vsel %vm1214_vm9, %v1219_v33, %v1220_v44 }
 0x650   : > { %v1237_v41 = vpop.permute.xlu0 %1236 }
 0x651   : > { %v1247_v43 = vadd.f32 %v1237_v41, %v1224_v35 }
 0x652   : > { %v1235_v45 = vpop.permute.xlu1 %1234 }
 0x653   : > { %v1246_v47 = vadd.f32 %v1235_v45, %v1226_v46  ;;  %v1257_v48 = vadd.f32 %v2006_v42, %v1247_v43 }
 0x655   : > { %v1256_v49 = vadd.f32 %v2006_v42, %v1246_v47  ;;  %v1265_v54 = vmax.f32 %v1257_v48, 0.0 }
 0x656   : > { %v1241_v50 = vpop.permute.xlu0 %1240 }
 0x657   : > { %v1264_v52 = vmax.f32 %v1256_v49, 0.0  ;;  %v1249_v53 = vadd.f32 %v1241_v50, %v1222_v51 }
 0x658   : > { %v1239_v55 = vpop.permute.xlu1 %1238 }
 0x659   : > { %v1259_v58 = vadd.f32 %v2006_v42, %v1249_v53  ;;  %v1248_v59 = vadd.f32 %v1239_v55, %v1223_v56  ;;  %2214 = vmatprep.mubr.msk.f32.mxu1 %vm610_vm3, %v1264_v52 }
 0x65a   : > { %2215 = vmatmul.mubr.msk.f32.vlgmr.msra.gmra.mxu1 %vm610_vm3, %v1265_v54 }
 0x65b   : > { %v1267_v60 = vmax.f32 %v1259_v58, 0.0  ;;  %v1258_v61 = vadd.f32 %v2006_v42, %v1248_v59  ;;  %2221 = vmatpush3.msra.mxu1 %v1449_v2  ;;  %v1674_v58 = vld [vmem:[%s2995_s10 + $0x70] sm:$0xff]  ;;  %v1689_v59 = vld [vmem:[%s2995_s10 + $0xe8] sm:$0xff] }
 0x65c   : > { %2222 = vmatprep.subr.mxu1 %v1446_v5  ;;  %v1670_v2 = vld [vmem:[%s2995_s10 + $0x50] sm:$0xff] }
 0x65d   : > { %v1266_v62 = vmax.f32 %v1258_v61, 0.0  ;;  %v1271_v63 = vsel %vm1263_vm10, %v1267_v60, 0.0  ;;  %2223 = vmatpush3.msra.mxu1 %v1446_v5  ;;  %v1688_v60 = vld [vmem:[%s2995_s10 + $0xe0] sm:$0xff]  ;;  %v1695_v5 = vld [vmem:[%s2995_s10 + $0x118] sm:$0xff] }
 0x65e   : > { %2224 = vmatprep.subr.mxu1 %v1443_v9  ;;  %v1672_v61 = vld [vmem:[%s2995_s10 + $0x60] sm:$0xff] }
 0x65f   : > { %2217 = vmatprep.mubr.msk.f32.mxu1 %vm610_vm3, %v1266_v62  ;;  %2225 = vmatpush3.msra.mxu1 %v1443_v9  ;;  %v1687_v62 = vld [vmem:[%s2995_s10 + $0xd8] sm:$0xff] }
 0x660   : > { %2218 = vmatmul.mubr.msk.f32.gmra.mxu1 %vm610_vm3, %v1271_v63  ;;  %2226 = vmatprep.subr.mxu1 %v1440_v16  ;;  %v1697_v63 = vld [vmem:[%s2995_s10 + $0x128] sm:$0xff]  ;;  %v1683_v9 = vld [vmem:[%s2995_s10 + $0xb8] sm:$0xff] }
 0x661   : > { %2227 = vmatpush3.msra.mxu1 %v1440_v16  ;;  %v1666_v16 = vld [vmem:[%s2995_s10 + $0x30] sm:$0xff] }
 0x662   : > { %2234 = vmatprep.subr.mxu1 %v1699_v19 }
 0x71a   : > { %v2216_v21 = vpop.f32.mrf.mxu1 }
 0x71b   : > { %1394 = vrot.lane.b32.xlu0 %v2216_v21, %s3011_s29  ;;  %v1377_v23 = vrot.slane %v2216_v21, 4  ;;  %v1681_v21 = vld [vmem:[%s2995_s10 + $0xa8] sm:$0xff] }
 0x71c   : > { %v1357_v22 = vpop.f32.mrf.mxu1 }
 0x71d   : > { %v1376_v25 = vrot.slane %v1357_v22, 4  ;;  %1392 = vrot.lane.b32.xlu1 %v1357_v22, %s3011_s29  ;;  %v1665_v22 = vld [vmem:[%s2995_s10 + $0x28] sm:$0xff] }
 0x71f   : > { %v1382_v27 = vsel %vm1214_vm9, %v1376_v25, %v1377_v23 }
 0x720   : > { %v2219_v31 = vpop.f32.mrf.mxu1 }
 0x721   : > { %v1379_v12 = vrot.slane %v2219_v31, 4  ;;  %1398 = vrot.lane.b32.xlu0 %v2219_v31, %s3011_s29  ;;  %v1663_v31 = vld [vmem:[%s2995_s10 + $0x18] sm:$0xff] }
 0x722   : > { %v1367_v14 = vpop.f32.mrf.mxu1 }
 0x723   : > { %1396 = vrot.lane.b32.xlu1 %v1367_v14, %s3011_s29  ;;  %v1383_v17 = vsel %vm1214_vm9, %v1379_v12, %v1376_v25  ;;  %v1378_v34 = vrot.slane %v1367_v14, 4  ;;  %v1664_v25 = vld [vmem:[%s2995_s10 + $0x20] sm:$0xff]  ;;  %v1662_v14 = vld [vmem:[%s2995_s10 + $0x10] sm:$0xff]  ;;  %s2029_s29 = sshll.u32 %s2450_s25, 4  ;;  %s2304_s25 = scalar_lea.vmem %s2303_s28, 32 }
 0x724   : > { %v1384_v36 = vsel %vm1214_vm9, 0.0, %v1383_v17  ;;  %v1694_v17 = vld [vmem:[%s2995_s10 + $0x110] sm:$0xff]  ;;  %s1912_s18 = scalar_lea.hbm %s2997_s12, %s2029_s29  ;;  %p2306_p1 = scmp.lt.s32.totalorder %s2304_s25, %s2298_s1 }
 0x725   : > { %v1380_v43 = vsel %vm1214_vm9, %v1378_v34, %v1379_v12  ;;  %v1381_v48 = vsel %vm1214_vm9, %v1377_v23, %v1378_v34  ;;  %v1680_v23 = vld [vmem:[%s2995_s10 + $0xa0] sm:$0xff]  ;;  %v1678_v12 = vld [vmem:[%s2995_s10 + $0x90] sm:$0xff] }
 0x726   : > { %v1692_v34 = vld [vmem:[%s2995_s10 + $0x100] sm:$0xff]  ;;  %p2307_p2 = por %p2306_p1, %p2305_p0 }
 0x728   : > { %p2308_p3 = pnand %p2307_p2, %p2301_p13 }
 0x78d   : > { %v1395_v32 = vpop.permute.xlu0 %1394 }
 0x78e   : > { %v1405_v33 = vadd.f32 %v1395_v32, %v1382_v27  ;;  %v1679_v27 = vld [vmem:[%s2995_s10 + $0x98] sm:$0xff]  ;;  %v1676_v32 = vld [vmem:[%s2995_s10 + $0x80] sm:$0xff] }
 0x78f   : > { %v1393_v35 = vpop.permute.xlu1 %1392 }
 0x790   : > { %v1415_v37 = vadd.f32 %v2016_v20, %v1405_v33  ;;  %v1404_v38 = vadd.f32 %v1393_v35, %v1384_v36  ;;  %v1660_v33 = vld [vmem:[%s2995_s10] sm:$0xff]  ;;  %v1637_v36 = vld [vmem:[%s2994_s9 + $0x8] sm:$0xff] }
 0x792   : > { %v1423_v40 = vmax.f32 %v1415_v37, 0.0  ;;  %v1414_v41 = vadd.f32 %v2016_v20, %v1404_v38  ;;  %v1636_v37 = vld [vmem:[%s2994_s9] sm:$0xff] }
 0x793   : > { %v1399_v42 = vpop.permute.xlu0 %1398 }
 0x794   : > { %v1422_v44 = vmax.f32 %v1414_v41, 0.0  ;;  %v1407_v45 = vadd.f32 %v1399_v42, %v1380_v43  ;;  %v1431_v46 = vadd.f32 %v1423_v40, %v1109_v29  ;;  %v1638_v40 = vld [vmem:[%s2994_s9 + $0x10] sm:$0xff]  ;;  %v1641_v41 = vld [vmem:[%s2994_s9 + $0x28] sm:$0xff] }
 0x795   : > { %v1397_v47 = vpop.permute.xlu1 %1396 }
 0x796   : > { %v1430_v49 = vadd.f32 %v1422_v44, %v1108_v28  ;;  %v1417_v50 = vadd.f32 %v2016_v20, %v1407_v45  ;;  %v1406_v51 = vadd.f32 %v1397_v47, %v1381_v48  ;;  %v1435_v55 = vmax.f32 %v1431_v46, 0.0  ;;  %v1640_v48 = vld [vmem:[%s2994_s9 + $0x20] sm:$0xff] }
 0x798   : > { %v1434_v52 = vmax.f32 %v1430_v49, 0.0  ;;  %v1425_v53 = vmax.f32 %v1417_v50, 0.0  ;;  %v1416_v54 = vadd.f32 %v2016_v20, %v1406_v51  ;;  %v1693_v20 = vld [vmem:[%s2995_s10 + $0x108] sm:$0xff]  ;;  %v1639_v50 = vld [vmem:[%s2994_s9 + $0x18] sm:$0xff] }
 0x79a   : > { %v1429_v29 = vsel %vm1421_vm11, %v1425_v53, 0.0  ;;  %v1424_v56 = vmax.f32 %v1416_v54, 0.0  ;;  %2017 = vmatmul.mubr.msk.f32.vlgmr.msra.gmra.mxu0 %vm610_vm3, %v1434_v52  ;;  %2228 = vmatprep.mubr.msk.f32.mxu1 %vm610_vm3, %v1434_v52  ;;  %v1644_v54 = vld [vmem:[%s2994_s9 + $0x40] sm:$0xff] }
 0x79b   : > { %v1433_v28 = vadd.f32 %v1429_v29, %v2670_v30  ;;  %2229 = vmatmul.mubr.msk.f32.vlgmr.msra.gmra.mxu1 %vm610_vm3, %v1435_v55  ;;  %1532 = vmatprep.mubr.f32.mxu0 %v2362_v39 }
 0x79c   : > { %v1432_v57 = vadd.f32 %v1424_v56, %v1110_v10  ;;  %2087 = vmatpush3.msra.mxu0 %v1675_v24  ;;  %2235 = vmatpush3.msra.mxu1 %v1699_v19  ;;  %v1661_v19 = vld [vmem:[%s2995_s10 + $0x8] sm:$0xff]  ;;  %v1647_v24 = vld [vmem:[%s2994_s9 + $0x58] sm:$0xff] }
 0x79d   : > { %2088 = vmatprep.subr.mxu0 %v1690_v15  ;;  %2236 = vmatprep.subr.mxu1 %v1698_v26  ;;  %v1437_v10 = vmax.f32 %v1433_v28, 0.0  ;;  %v1643_v56 = vld [vmem:[%s2994_s9 + $0x38] sm:$0xff]  ;;  %v1642_v15 = vld [vmem:[%s2994_s9 + $0x30] sm:$0xff] }
 0x79e   : > { %v1436_v30 = vmax.f32 %v1432_v57, 0.0  ;;  %2018 = vmatmul.mubr.msk.f32.gmra.mxu0 %vm610_vm3, %v1435_v55  ;;  %2237 = vmatpush3.msra.mxu1 %v1698_v26 }
 0x79f   : > { %1538 = vmatprep.mubr.f32.mxu0 %v2362_v39  ;;  %2089 = vmatpush3.msra.mxu0 %v1674_v58 }
 0x7a0   : > { %2231 = vmatprep.mubr.msk.f32.mxu1 %vm610_vm3, %v1436_v30  ;;  %2090 = vmatprep.subr.mxu0 %v1689_v59 }
 0x7a1   : > { %2232 = vmatmul.mubr.msk.f32.gmra.mxu1 %vm610_vm3, %v1437_v10  ;;  %2091 = vmatpush3.msra.mxu0 %v1673_v6 }
 0x7a2   : > { %2019 = vmatmul.mubr.msk.f32.gmra.mxu0 %vm610_vm3, %v1436_v30  ;;  %2092 = vmatprep.subr.mxu0 %v1688_v60  ;;  %v1645_v60 = vld [vmem:[%s2994_s9 + $0x48] sm:$0xff] }
 0x7a3   : > { %1544 = vmatprep.mubr.f32.mxu0 %v2362_v39  ;;  %2093 = vmatpush3.msra.mxu0 %v1672_v61  ;;  %v1685_v39 = vld [vmem:[%s2995_s10 + $0xc8] sm:$0xff] }
 0x7a4   : > { %2094 = vmatprep.subr.mxu0 %v1687_v62  ;;  %2238 = vmatprep.subr.mxu1 %v1697_v63 }
 0x7a5   : > { %2095 = vmatpush3.msra.mxu0 %v1671_v0  ;;  %2239 = vmatpush3.msra.mxu1 %v1697_v63 }
 0x7a6   : > { %2020 = vmatmul.mubr.msk.f32.gmra.mxu0 %vm610_vm3, %v1437_v10  ;;  %2096 = vmatprep.subr.mxu0 %v1686_v1  ;;  %v1646_v10 = vld [vmem:[%s2994_s9 + $0x50] sm:$0xff] }
 0x7a7   : > { %2097 = vmatpush3.msra.mxu0 %v1670_v2  ;;  %2240 = vmatprep.subr.mxu1 %v1696_v3 }
 0x7a8   : > { %2098 = vmatprep.subr.mxu0 %v1685_v39  ;;  %2241 = vmatpush3.msra.mxu1 %v1696_v3 }
 0x7a9   : > { %2099 = vmatpush3.msra.mxu0 %v1669_v4  ;;  %2242 = vmatprep.subr.mxu1 %v1695_v5 }
 0x7aa   : > { %2100 = vmatprep.subr.mxu0 %v1684_v7  ;;  %2243 = vmatpush3.msra.mxu1 %v1695_v5 }
 0x7ab   : > { %2101 = vmatpush3.msra.mxu0 %v1668_v8  ;;  %2244 = vmatprep.subr.mxu1 %v1694_v17 }
 0x7ac   : > { %2102 = vmatprep.subr.mxu0 %v1683_v9  ;;  %2245 = vmatpush3.msra.mxu1 %v1694_v17 }
 0x7ad   : > { %2103 = vmatpush3.msra.mxu0 %v1667_v11  ;;  %2246 = vmatprep.subr.mxu1 %v1693_v20 }
 0x7ae   : > { %2104 = vmatprep.subr.mxu0 %v1682_v13  ;;  %2247 = vmatpush3.msra.mxu1 %v1693_v20 }
 0x7af   : > { %2105 = vmatpush3.msra.mxu0 %v1666_v16  ;;  %2248 = vmatprep.subr.mxu1 %v1692_v34 }
 0x7b0   : > { %2106 = vmatprep.subr.mxu0 %v1681_v21  ;;  %2249 = vmatpush3.msra.mxu1 %v1692_v34 }
 0x7b1   : > { %2107 = vmatpush3.msra.mxu0 %v1665_v22 }
 0x7b2   : > { %2108 = vmatprep.subr.mxu0 %v1680_v23 }
 0x7b3   : > { %2109 = vmatpush3.msra.mxu0 %v1664_v25 }
 0x7b4   : > { %2110 = vmatprep.subr.mxu0 %v1679_v27 }
 0x7b5   : > { %2111 = vmatpush3.msra.mxu0 %v1663_v31 }
 0x7b6   : > { %2112 = vmatprep.subr.mxu0 %v1678_v12 }
 0x7b7   : > { %2113 = vmatpush3.msra.mxu0 %v1662_v14 }
 0x7b8   : > { %2114 = vmatprep.subr.mxu0 %v1677_v18 }
 0x7b9   : > { %2115 = vmatpush3.msra.mxu0 %v1661_v19 }
 0x7ba   : > { %2116 = vmatprep.subr.mxu0 %v1676_v32 }
 0x7bb   : > { %2117 = vmatpush3.msra.mxu0 %v1660_v33 }
 0x85a   : > { %v1528_v35 = vpop.f32.mrf.mxu0 }
 0x85b   : > { %v2230_v38 = vpop.f32.mrf.mxu1  ;;  %v1648_v45 = vmul.f32 %v1636_v37, %v1528_v35 }
 0x85c   : > { %v1530_v42 = vpop.f32.mrf.mxu0  ;;  %v1653_v49 = vmul.f32 %v2230_v38, %v1641_v41 }
 0x85d   : > { %v1649_v43 = vmul.f32 %v1637_v36, %v1530_v42  ;;  %v1617_v44 = vpop.f32.mrf.mxu1 }
 0x85e   : > { %v1650_v46 = vmul.f32 %v1638_v40, %v1617_v44  ;;  %v1534_v47 = vpop.f32.mrf.mxu0  ;;  %v1897_v40 = vld [vmem:[%s2996_s11] sm:$0x1] }
 0x85f   : > { %1777 = vmatprep.mubr.f32.mxu0 %v1649_v43  ;;  %v1651_v55 = vmul.f32 %v1639_v50, %v1534_v47 }
 0x860   : > { %v1536_v51 = vpop.f32.mrf.mxu0  ;;  %1778 = vmatmul.mubr.f32.vlgmr.msra.gmra.mxu0 %v1648_v45  ;;  %2250 = vmatprep.mubr.msk.f32.mxu1 %vm1700_vm12, %v1650_v46 }
 0x861   : > { %v1652_v52 = vmul.f32 %v1640_v48, %v1536_v51  ;;  %v2233_v53 = vpop.f32.mrf.mxu1  ;;  %2251 = vmatmul.mubr.msk.f32.vlgmr.msra.gmra.mxu1 %vm1700_vm12, %v1653_v49 }
 0x862   : > { %v1540_v29 = vpop.f32.mrf.mxu0  ;;  %v1659_v58 = vmul.f32 %v2233_v53, %v1647_v24 }
 0x863   : > { %v1627_v26 = vpop.f32.mrf.mxu1  ;;  %1782 = vmatprep.mubr.f32.mxu0 %v1652_v52  ;;  %v1654_v30 = vmul.f32 %v1642_v15, %v1540_v29 }
 0x864   : > { %v1656_v28 = vmul.f32 %v1644_v54, %v1627_v26  ;;  %v1542_v57 = vpop.f32.mrf.mxu0  ;;  %1783 = vmatmul.mubr.f32.gmra.mxu0 %v1651_v55 }
 0x865   : > { %v1655_v59 = vmul.f32 %v1643_v56, %v1542_v57 }
 0x866   : > { %v1546_v6 = vpop.f32.mrf.mxu0  ;;  %2253 = vmatprep.mubr.msk.f32.mxu1 %vm1700_vm12, %v1656_v28 }
 0x867   : > { %1787 = vmatprep.mubr.f32.mxu0 %v1655_v59  ;;  %2254 = vmatmul.mubr.msk.f32.gmra.mxu1 %vm1700_vm12, %v1659_v58  ;;  %v1657_v63 = vmul.f32 %v1645_v60, %v1546_v6 }
 0x868   : > { %v1548_v61 = vpop.f32.mrf.mxu0  ;;  %1788 = vmatmul.mubr.f32.gmra.mxu0 %v1654_v30 }
 0x869   : > { %v1658_v62 = vmul.f32 %v1646_v10, %v1548_v61 }
 0x86b   : > { %1792 = vmatprep.mubr.f32.mxu0 %v1658_v62 }
 0x86c   : > { %1793 = vmatmul.mubr.f32.gmra.mxu0 %v1657_v63 }
 0x920   : > { %v2118_v0 = vpop.f32.mrf.mxu0 }
 0x921   : > { %v2252_v1 = vpop.f32.mrf.mxu1 }
 0x922   : > { %v2119_v2 = vpop.f32.mrf.mxu0 }
 0x923   : > { %v1864_v39 = vpop.f32.mrf.mxu1  ;;  %v2120_v5 = vadd.f32 %v2119_v2, %v2118_v0 }
 0x924   : > { %v2121_v3 = vpop.f32.mrf.mxu0 }
 0x925   : > { %v1865_v16 = vadd.f32 %v2120_v5, %v1864_v39 }
 0x926   : > { %v2122_v4 = vpop.f32.mrf.mxu0 }
 0x927   : > { %v2123_v7 = vadd.f32 %v2122_v4, %v2121_v3  ;;  %v2255_v8 = vpop.f32.mrf.mxu1  ;;  %v1884_v12 = vsel %vm1883_vm13, %v1865_v16, 0.0 }
 0x928   : > { %v2124_v9 = vpop.f32.mrf.mxu0 }
 0x929   : > { %v1870_v11 = vadd.f32 %v2252_v1, %v2123_v7  ;;  %v1874_v22 = vpop.f32.mrf.mxu1 }
 0x92a   : > { %v2125_v13 = vpop.f32.mrf.mxu0 }
 0x92b   : > { %v2126_v21 = vadd.f32 %v2125_v13, %v2124_v9  ;;  %v1885_v25 = vsel %vm1883_vm13, %v1870_v11, 0.0 }
 0x92c   : > { %v2127_v23 = vpop.f32.mrf.mxu0  ;;  %v1886_v18 = vadd.f32 %v1885_v25, %v1884_v12 }
 0x92d   : > { %v1875_v27 = vadd.f32 %v2126_v21, %v1874_v22 }
 0x92e   : > { %v2128_v31 = vpop.f32.mrf.mxu0 }
 0x92f   : > { %v1887_v14 = vsel %vm1883_vm13, %v1875_v27, 0.0  ;;  %v2129_v17 = vadd.f32 %v2128_v31, %v2127_v23 }
 0x930   : > { %v1888_v20 = vadd.f32 %v1887_v14, %v1886_v18 }
 0x931   : > { %v1880_v19 = vadd.f32 %v2255_v8, %v2129_v17 }
 0x933   : > { %v1889_v32 = vsel %vm1883_vm13, %v1880_v19, 0.0 }
 0x934   : > { %v1890_v33 = vadd.f32 %v1889_v32, %v1888_v20 }
 0x936   : > { %v1891_v34 = vrot.slane %v1890_v33, 4 }
 0x938   : > { %v1892_v35 = vadd.f32 %v1891_v34, %v1890_v33 }
 0x93a   : > { %v1893_v36 = vrot.slane %v1892_v35, 2 }
 0x93c   : > { %v1894_v37 = vadd.f32 %v1893_v36, %v1892_v35 }
 0x93e   : > { %v1895_v38 = vrot.slane %v1894_v37, 1 }
 0x940   : > { %v1896_v41 = vadd.f32 %v1895_v38, %v1894_v37 }
 0x942   : > { %v1898_v42 = vadd.f32 %v1897_v40, %v1896_v41 }
 0x944   : > { %1900 = vst.msk [vmem:[%s405_s16] sm:$0x1] %vm1899_vm14, %v1898_v42 }
 0x945   : > { %2311 = shalt.err (!%p2308_p3)
}
 0x946   : > { %s2312_s2 = scalar_lea.hbm %s1912_s18, 16  ;;  %s2316_s16 = scalar_lea.hbm %s2997_s12, 32 }
 0x947   : > { %p2313_p4 = scmp.ne.s32.totalorder %s1912_s18, %s2312_s2  ;;  %p2317_p9 = scmp.lt.s32.totalorder %s1912_s18, %s2997_s12 }
 0x948   : > { %p2318_p10 = scmp.lt.s32.totalorder %s2316_s16, %s2312_s2 }
 0x949   : > { %p2314_p7 = pnand %p2313_p4, %p2467_p5 }
 0x94a   : > { %p2319_p11 = por %p2318_p10, %p2317_p9 }
 0x94b   : > { %p2315_p8 = pneg %p2314_p7 }
 0x94d   : > { %p2320_p12 = pnand %p2319_p11, %p2315_p8 }
 0x94f   : > { %2323 = shalt.err (!%p2320_p12)
}
 0x950   : > { %2256 = dma.vmem_to_hbm [thread:$0]  (%p2467_p5), %s1915_s17, 16, %s1912_s18, %s1902_s15  }
 0x951 PF: > { %p2262_p13 = scmp.ge.s32.totalorder %s2358_s24, 2  ;;  %s1926_s1 = sand.u32 1, %s2346_s21  }
 0x952   : > { %s1927_s20 = scalar_lea.sflag [#allocation3], %s1926_s1 }
 0x953   : > { %p2259_p0 = pnand %p2262_p13, %p2471_p6 }
 0x955   : > { %p2260_p1 = pneg %p2259_p0 }
 0x957   : > { %2341 = dma.done.wait (%p2260_p1), %s1927_s20, 16  }
 0x958   : > { %2343 = vsyncadd (%p2260_p1), %s1927_s20, 4294967280  ;;  %p22_p2 = scmp.ge.s32.totalorder %s2454_s27, 4   ;;  %s3012_s21 = smov %s2350_s22 }
 0x959   : > { %s3013_s22 = smov %s2354_s23  ;;  %s3014_s23 = smov %s2465_s30 }
 0x95a   : > { %s3015_s24 = smov %s2454_s27  ;;  %24 = sbr.rel (!%p22_p2) target bundleno = 7 (0x7), region = 109 }
 0x95f   :  { %1931 = vsyncpa [#allocation3], 1 }
 0x960   :  { %1933 = vsyncpa [#allocation3 + $0x1], 1 }

</bundles_post_ra>
